<compile_context>
chip_gen: v5e
topology: v5e:2x2
jax: 0.10.0
libtpu: 0.0.40
codegen_flags: <defaults>
</compile_context>

<pallas_src>
import functools
import math

import jax
import jax.numpy as jnp
import numpy as np
from jax.experimental import pallas as pl
from jax.experimental.pallas import tpu as pltpu


def _round_up(v, m):
    return (v + m - 1) // m * m


def _device_kind():
    try:
        return jax.devices()[0].device_kind.lower()
    except Exception:
        return ""


def _stft_loss_kernel(xf_ref, yf_ref, basis_ref, nyq_ref, out_ref, *, k_pad):
    """Per-tile partial sums: [sum((ymag-xmag)^2), sum(ymag^2), sum|log ymag - log xmag|]."""
    xf = xf_ref[...]                 # (TM, fft)  raw frames, predicted signal (compute dtype)
    yf = yf_ref[...]                 # (TM, fft)  raw frames, groundtruth signal
    basis = basis_ref[...]           # (fft, 2*k_pad)  [win*cos | -win*sin], bins 0..fft/2-1

    # Two wide MXU matmuls (real and imaginary parts of bins 0..fft/2-1 computed together).
    xri = jnp.dot(xf, basis, preferred_element_type=jnp.float32)   # (TM, 2*k_pad) f32
    yri = jnp.dot(yf, basis, preferred_element_type=jnp.float32)
    xr, xi = xri[:, :k_pad], xri[:, k_pad:]
    yr, yi = yri[:, :k_pad], yri[:, k_pad:]

    # torch: clamp(real^2 + imag^2, min=1e-7)
    x2 = jnp.maximum(xr * xr + xi * xi, 1e-7)
    y2 = jnp.maximum(yr * yr + yi * yi, 1e-7)

    # Nyquist bin (k = fft/2): imag part is exactly 0, real part = frame . (win * (-1)^n).
    nyq = nyq_ref[...]                                    # (1, fft) f32
    xn = jnp.sum(xf * nyq, axis=-1, keepdims=True)        # (TM, 1) f32
    yn = jnp.sum(yf * nyq, axis=-1, keepdims=True)
    xn2 = jnp.maximum(xn * xn, 1e-7)
    yn2 = jnp.maximum(yn * yn, 1e-7)

    # (ymag - xmag)^2 = x2 + y2 - 2*sqrt(x2*y2)   (1 sqrt/elem instead of 2; clamp roundoff)
    ssd = (jnp.sum(jnp.maximum(x2 + y2 - 2.0 * jnp.sqrt(x2 * y2), 0.0)) +
           jnp.sum(jnp.maximum(xn2 + yn2 - 2.0 * jnp.sqrt(xn2 * yn2), 0.0)))
    # ymag^2 == clamped power (padded rows/cols contribute exactly 1e-7 each; fixed up later).
    ssy = jnp.sum(y2) + jnp.sum(yn2)
    # |log ymag - log xmag| = 0.5 * |log y2 - log x2|   (2 logs/elem instead of 2 log + 2 sqrt)
    sal = 0.5 * (jnp.sum(jnp.abs(jnp.log(y2) - jnp.log(x2))) +
                 jnp.sum(jnp.abs(jnp.log(yn2) - jnp.log(xn2))))

    # Lane-dense (8,128) partials block: [ssd, ssy, sal] at sublane 0, lanes 0..2.
    r8 = jax.lax.broadcasted_iota(jnp.int32, (8, 128), 0)
    l8 = jax.lax.broadcasted_iota(jnp.int32, (8, 128), 1)
    out = jnp.where((r8 == 0) & (l8 == 0), ssd, 0.0)
    out = jnp.where((r8 == 0) & (l8 == 1), ssy, out)
    out = jnp.where((r8 == 0) & (l8 == 2), sal, out)
    out_ref[...] = out


class STFTLossPallas:
    """JAX/Pallas equivalent of the PyTorch STFTLoss module (forward pass)."""

    def __init__(self, fft_size=1024, shift_size=120, win_length=600,
                 window="hann_window", tile_m=None, compute_dtype=jnp.bfloat16):
        assert window == "hann_window"
        assert fft_size % 2 == 0
        self.fft_size = fft_size
        self.shift_size = shift_size
        self.win_length = win_length
        self.compute_dtype = compute_dtype

        kind = _device_kind()
        is_v5 = "v5" in kind
        # v5e: smallest MXU / no bf16 VPU -> keep 256-row tiles; v6e/v7x: 512 frame rows/tile.
        self.tile_m = tile_m if tile_m is not None else (256 if is_v5 else 512)
        # 48 MiB is safe on v7x's 64 MiB physical VMEM; 32 MiB covers v5e's 16 MiB scoped default.
        self.vmem_limit_bytes = (32 if is_v5 else 48) * 1024 * 1024

        # torch.hann_window(win_length) (periodic), centred zero-pad to fft_size (torch.stft).
        n = np.arange(win_length, dtype=np.float64)
        win = 0.5 - 0.5 * np.cos(2.0 * math.pi * n / win_length)
        lpad = (fft_size - win_length) // 2
        win_padded = np.zeros(fft_size, dtype=np.float64)
        win_padded[lpad:lpad + win_length] = win
        self._window = jnp.asarray(win_padded, dtype=jnp.float32)   # for reference checks

        # One-sided real DFT basis over bins 0..fft/2-1 with the window folded in, padded to a
        # lane multiple and concatenated into one (fft, 2*k_pad) operand [win*cos | -win*sin].
        # The Nyquist bin (k = fft/2) is handled separately in-kernel on the VPU.
        self.n_bins = fft_size // 2 + 1
        self.k_body = fft_size // 2
        self.k_pad = _round_up(self.k_body, 128)
        nn = np.arange(fft_size, dtype=np.float64)[:, None]
        kk = np.arange(self.k_pad, dtype=np.float64)[None, :]
        ang = 2.0 * math.pi * nn * kk / fft_size
        col_mask = (np.arange(self.k_pad) < self.k_body)[None, :]
        cosb = np.where(col_mask, np.cos(ang), 0.0) * win_padded[:, None]
        sinb = np.where(col_mask, -np.sin(ang), 0.0) * win_padded[:, None]
        self._basis = jnp.asarray(np.concatenate([cosb, sinb], axis=1), dtype=compute_dtype)
        sign = np.where(np.arange(fft_size) % 2 == 0, 1.0, -1.0)
        self._nyq = jnp.asarray((win_padded * sign)[None, :], dtype=jnp.float32)   # (1, fft)

    def _frames(self, x):
        """(B, T) -> (B*n_frames, fft) raw frames (center=True, reflect pad), compute dtype.

        Framing uses q = ceil(fft/shift) shifted slices + reshape + concat ("slabs"): pure
        data movement, no gather and no convolution.  The Hann window is folded into the
        DFT basis, so no window multiply happens here.
        """
        B, T = x.shape
        L, S = self.fft_size, self.shift_size
        pad = L // 2
        xp = jnp.pad(x, ((0, 0), (pad, pad)), mode="reflect").astype(self.compute_dtype)
        n_frames = 1 + T // S                        # torch.stft, center=True
        q = -(-L // S)
        need = (n_frames + q - 1) * S                # right-pad so every slab slice is in-bounds
        if need > xp.shape[1]:
            xp = jnp.pad(xp, ((0, 0), (0, need - xp.shape[1])))
        slabs = [xp[:, k * S:k * S + n_frames * S].reshape(B, n_frames, S) for k in range(q)]
        frames = jnp.concatenate(slabs, axis=2)[:, :, :L]
        return frames.reshape(B * n_frames, L), n_frames

    def __call__(self, x, y):
        xf, _ = self._frames(x)
        yf, _ = self._frames(y)
        M = xf.shape[0]                              # B * n_frames (real rows)
        fft, kp = self.fft_size, self.k_pad

        # At least two tiles for short clips (v7x 2-TC split of the "parallel" axis); rows are
        # zero-padded to FULL tiles so no partial blocks exist -> no in-kernel validity masks.
        M8 = _round_up(M, 8)
        tile_m = max(8, min(self.tile_m, _round_up(pl.cdiv(M8, 2), 8)))
        num_tiles = pl.cdiv(M8, tile_m)
        M_pad = num_tiles * tile_m
        if M_pad != M:
            xf = jnp.pad(xf, ((0, M_pad - M), (0, 0)))
            yf = jnp.pad(yf, ((0, M_pad - M), (0, 0)))

        itemsize = jnp.dtype(self.compute_dtype).itemsize
        kernel = functools.partial(_stft_loss_kernel, k_pad=kp)
        cost = pl.CostEstimate(
            flops=int(8 * M_pad * fft * kp + 4 * M_pad * fft),
            transcendentals=int(3 * M_pad * (kp + 1)),
            bytes_accessed=int(2 * M_pad * fft * itemsize + fft * 2 * kp * itemsize
                               + fft * 4 + num_tiles * 8 * 128 * 4),
        )

        def call(single_buffer_basis):
            def resident(shape):
                if single_buffer_basis:
                    return pl.BlockSpec(shape, lambda i: (0, 0), pipeline_mode=pl.Buffered(1))
                return pl.BlockSpec(shape, lambda i: (0, 0))
            return pl.pallas_call(
                kernel,
                grid=(num_tiles,),
                out_shape=jax.ShapeDtypeStruct((num_tiles * 8, 128), jnp.float32),
                in_specs=[
                    pl.BlockSpec((tile_m, fft), lambda i: (i, 0)),
                    pl.BlockSpec((tile_m, fft), lambda i: (i, 0)),
                    resident((fft, 2 * kp)),          # VMEM-resident DFT basis
                    resident((1, fft)),               # VMEM-resident Nyquist vector
                ],
                out_specs=pl.BlockSpec((8, 128), lambda i: (i, 0)),
                compiler_params=pltpu.CompilerParams(
                    dimension_semantics=("parallel",),
                    vmem_limit_bytes=self.vmem_limit_bytes,
                ),
                cost_estimate=cost,
            )(xf, yf, self._basis, self._nyq)

        try:
            partials = call(single_buffer_basis=True)
        except Exception:
            # TODO(synk): pl.Buffered(1) pipeline_mode unsupported on this JAX build; fall back
            # to default double-buffering of the resident basis.
            partials = call(single_buffer_basis=False)

        totals = jnp.sum(partials, axis=0)            # (128,), sums at lanes 0..2
        ssd, ssy, sal = totals[0], totals[1], totals[2]

        # Zero-padded rows and zero basis columns contribute exactly clamp(0,1e-7)=1e-7 to ssy
        # (and 0 to ssd/sal); subtract that known constant instead of masking in-kernel.
        excess = num_tiles * tile_m * (kp + 1) - M * self.n_bins
        ssy = ssy - jnp.float32(1e-7 * excess)

        # SpectralConvergengeLoss: ||y_mag - x_mag||_F / ||y_mag||_F
        sc_loss = jnp.sqrt(ssd) / jnp.sqrt(ssy)
        # LogSTFTMagnitudeLoss: mean |log y_mag - log x_mag| over (B, #frames, #freq_bins)
        mag_loss = sal / jnp.float32(M * self.n_bins)
        return sc_loss, mag_loss


def _reference_losses(mod, x, y):
    """Pure-JAX f32 reference (rfft-based) matching the torch STFTLoss forward."""
    def mag(sig):
        pad = mod.fft_size // 2
        sp = jnp.pad(sig, ((0, 0), (pad, pad)), mode="reflect")
        n_frames = 1 + sig.shape[1] // mod.shift_size
        starts = np.arange(n_frames) * mod.shift_size
        idx = starts[:, None] + np.arange(mod.fft_size)[None, :]
        fr = sp[:, idx] * mod._window[None, None, :]
        spec = jnp.fft.rfft(fr, axis=-1)
        return jnp.sqrt(jnp.maximum(jnp.real(spec) ** 2 + jnp.imag(spec) ** 2, 1e-7))

    xm, ym = mag(x), mag(y)
    sc = jnp.sqrt(jnp.sum((ym - xm) ** 2)) / jnp.sqrt(jnp.sum(ym ** 2))
    ml = jnp.mean(jnp.abs(jnp.log(ym) - jnp.log(xm)))
    return sc, ml


if __name__ == "__main__":
    # Small but consistent STFT configuration (module defaults scaled down).
    fft_size, shift_size, win_length = 128, 32, 64
    B, T = 2, 256

    key = jax.random.PRNGKey(0)
    kx, ky = jax.random.split(key)
    x = jax.random.normal(kx, (B, T), dtype=jnp.float32)
    y = jax.random.normal(ky, (B, T), dtype=jnp.float32)

    loss_mod = STFTLossPallas(fft_size=fft_size, shift_size=shift_size,
                              win_length=win_length, window="hann_window")
    sc_loss, mag_loss = loss_mod(x, y)
    jax.block_until_ready((sc_loss, mag_loss))

    # Validate the bf16 MXU path against a pure-JAX f32 rfft reference
    # (tolerance sized for bf16 input rounding; f32 accumulation throughout).
    sc_ref, mag_ref = _reference_losses(loss_mod, x, y)
    np.testing.assert_allclose(np.asarray(sc_loss), np.asarray(sc_ref), rtol=2e-2, atol=1e-3)
    np.testing.assert_allclose(np.asarray(mag_loss), np.asarray(mag_ref), rtol=2e-2, atol=1e-3)

    print("KERNEL_OK")
</pallas_src>

<mosaic_0001>
module attributes {stable_mosaic.version = 11 : i64} {
  func.func @_stft_loss_kernel(%arg0: i32, %arg1: memref<16x128xbf16, #tpu.memory_space<vmem>>, %arg2: memref<16x128xbf16, #tpu.memory_space<vmem>>, %arg3: memref<128x256xbf16, #tpu.memory_space<vmem>>, %arg4: memref<1x128xf32, #tpu.memory_space<vmem>>, %arg5: memref<8x128xf32, #tpu.memory_space<vmem>>) attributes {dimension_semantics = [#tpu.dimension_semantics<parallel>], iteration_bounds = array<i64: 2>, scalar_prefetch = 0 : i64, scratch_operands = 0 : i64, tpu.core_type = #tpu.core_type<tc>, window_params = [{transform_indices = @transform_0, window_bounds = array<i64: 16, 128>}, {transform_indices = @transform_1, window_bounds = array<i64: 16, 128>}, {pipeline_mode = #tpu.pipeline_mode<synchronous>, transform_indices = @transform_2, window_bounds = array<i64: 128, 256>}, {pipeline_mode = #tpu.pipeline_mode<synchronous>, transform_indices = @transform_3, window_bounds = array<i64: 1, 128>}, {transform_indices = @transform_4, window_bounds = array<i64: 8, 128>}]} {
    %c0 = arith.constant 0 : index
    %c0_0 = arith.constant 0 : index
    %0 = vector.load %arg1[%c0, %c0_0] : memref<16x128xbf16, #tpu.memory_space<vmem>>, vector<16x128xbf16>
    %c0_1 = arith.constant 0 : index
    %c0_2 = arith.constant 0 : index
    %1 = vector.load %arg2[%c0_1, %c0_2] : memref<16x128xbf16, #tpu.memory_space<vmem>>, vector<16x128xbf16>
    %c0_3 = arith.constant 0 : index
    %c0_4 = arith.constant 0 : index
    %2 = vector.load %arg3[%c0_3, %c0_4] : memref<128x256xbf16, #tpu.memory_space<vmem>>, vector<128x256xbf16>
    %cst = arith.constant dense<0.000000e+00> : vector<16x256xf32>
    %3 = tpu.matmul %0, %2, %cst {dimension_numbers = #tpu.dot_dimension_numbers<[1], [0], [0], [1], [0, 0, 1, 1], [], []>} : vector<16x128xbf16>, vector<128x256xbf16>, vector<16x256xf32> -> vector<16x256xf32>
    %cst_5 = arith.constant dense<0.000000e+00> : vector<16x256xf32>
    %4 = tpu.matmul %1, %2, %cst_5 {dimension_numbers = #tpu.dot_dimension_numbers<[1], [0], [0], [1], [0, 0, 1, 1], [], []>} : vector<16x128xbf16>, vector<128x256xbf16>, vector<16x256xf32> -> vector<16x256xf32>
    %5 = vector.extract_strided_slice %3 {offsets = [0, 0], sizes = [16, 128], strides = [1, 1]} : vector<16x256xf32> to vector<16x128xf32>
    %6 = vector.extract_strided_slice %3 {offsets = [0, 128], sizes = [16, 128], strides = [1, 1]} : vector<16x256xf32> to vector<16x128xf32>
    %7 = vector.extract_strided_slice %4 {offsets = [0, 0], sizes = [16, 128], strides = [1, 1]} : vector<16x256xf32> to vector<16x128xf32>
    %8 = vector.extract_strided_slice %4 {offsets = [0, 128], sizes = [16, 128], strides = [1, 1]} : vector<16x256xf32> to vector<16x128xf32>
    %9 = arith.mulf %5, %5 : vector<16x128xf32>
    %10 = arith.mulf %6, %6 : vector<16x128xf32>
    %11 = arith.addf %9, %10 : vector<16x128xf32>
    %cst_6 = arith.constant 1.000000e-07 : f32
    %12 = vector.broadcast %cst_6 : f32 to vector<16x128xf32>
    %13 = arith.maximumf %11, %12 : vector<16x128xf32>
    %14 = arith.mulf %7, %7 : vector<16x128xf32>
    %15 = arith.mulf %8, %8 : vector<16x128xf32>
    %16 = arith.addf %14, %15 : vector<16x128xf32>
    %cst_7 = arith.constant 1.000000e-07 : f32
    %17 = vector.broadcast %cst_7 : f32 to vector<16x128xf32>
    %18 = arith.maximumf %16, %17 : vector<16x128xf32>
    %c0_8 = arith.constant 0 : index
    %c0_9 = arith.constant 0 : index
    %19 = vector.load %arg4[%c0_8, %c0_9] : memref<1x128xf32, #tpu.memory_space<vmem>>, vector<1x128xf32>
    %20 = arith.extf %0 : vector<16x128xbf16> to vector<16x128xf32>
    %21 = vector.broadcast %19 : vector<1x128xf32> to vector<16x128xf32>
    %22 = arith.mulf %20, %21 : vector<16x128xf32>
    %cst_10 = arith.constant dense<0.000000e+00> : vector<16xf32>
    %23 = vector.multi_reduction <add>, %22, %cst_10 [1] : vector<16x128xf32> to vector<16xf32>
    %24 = vector.shape_cast %23 : vector<16xf32> to vector<16x1xf32>
    %25 = arith.extf %1 : vector<16x128xbf16> to vector<16x128xf32>
    %26 = vector.broadcast %19 : vector<1x128xf32> to vector<16x128xf32>
    %27 = arith.mulf %25, %26 : vector<16x128xf32>
    %cst_11 = arith.constant dense<0.000000e+00> : vector<16xf32>
    %28 = vector.multi_reduction <add>, %27, %cst_11 [1] : vector<16x128xf32> to vector<16xf32>
    %29 = vector.shape_cast %28 : vector<16xf32> to vector<16x1xf32>
    %30 = arith.mulf %24, %24 : vector<16x1xf32>
    %cst_12 = arith.constant 1.000000e-07 : f32
    %31 = vector.broadcast %cst_12 : f32 to vector<16x1xf32>
    %32 = arith.maximumf %30, %31 : vector<16x1xf32>
    %33 = arith.mulf %29, %29 : vector<16x1xf32>
    %cst_13 = arith.constant 1.000000e-07 : f32
    %34 = vector.broadcast %cst_13 : f32 to vector<16x1xf32>
    %35 = arith.maximumf %33, %34 : vector<16x1xf32>
    %36 = arith.addf %13, %18 : vector<16x128xf32>
    %37 = arith.mulf %13, %18 : vector<16x128xf32>
    %38 = math.sqrt %37 : vector<16x128xf32>
    %cst_14 = arith.constant 2.000000e+00 : f32
    %39 = vector.broadcast %cst_14 : f32 to vector<16x128xf32>
    %40 = arith.mulf %39, %38 : vector<16x128xf32>
    %41 = arith.subf %36, %40 : vector<16x128xf32>
    %cst_15 = arith.constant 0.000000e+00 : f32
    %42 = vector.broadcast %cst_15 : f32 to vector<16x128xf32>
    %43 = arith.maximumf %41, %42 : vector<16x128xf32>
    %44 = vector.shape_cast %43 : vector<16x128xf32> to vector<1x16x128xf32>
    %cst_16 = arith.constant dense<0.000000e+00> : vector<1xf32>
    %45 = vector.multi_reduction <add>, %44, %cst_16 [1, 2] : vector<1x16x128xf32> to vector<1xf32>
    %46 = vector.shape_cast %45 : vector<1xf32> to vector<1x1x1xf32>
    %47 = vector.extract %46[0, 0, 0] : f32 from vector<1x1x1xf32>
    %48 = arith.addf %32, %35 : vector<16x1xf32>
    %49 = arith.mulf %32, %35 : vector<16x1xf32>
    %50 = math.sqrt %49 : vector<16x1xf32>
    %cst_17 = arith.constant 2.000000e+00 : f32
    %51 = vector.broadcast %cst_17 : f32 to vector<16x1xf32>
    %52 = arith.mulf %51, %50 : vector<16x1xf32>
    %53 = arith.subf %48, %52 : vector<16x1xf32>
    %cst_18 = arith.constant 0.000000e+00 : f32
    %54 = vector.broadcast %cst_18 : f32 to vector<16x1xf32>
    %55 = arith.maximumf %53, %54 : vector<16x1xf32>
    %56 = vector.shape_cast %55 : vector<16x1xf32> to vector<1x16x1xf32>
    %cst_19 = arith.constant dense<0.000000e+00> : vector<1xf32>
    %57 = vector.multi_reduction <add>, %56, %cst_19 [1, 2] : vector<1x16x1xf32> to vector<1xf32>
    %58 = vector.shape_cast %57 : vector<1xf32> to vector<1x1x1xf32>
    %59 = vector.extract %58[0, 0, 0] : f32 from vector<1x1x1xf32>
    %60 = arith.addf %47, %59 : f32
    %61 = vector.shape_cast %18 : vector<16x128xf32> to vector<1x16x128xf32>
    %cst_20 = arith.constant dense<0.000000e+00> : vector<1xf32>
    %62 = vector.multi_reduction <add>, %61, %cst_20 [1, 2] : vector<1x16x128xf32> to vector<1xf32>
    %63 = vector.shape_cast %62 : vector<1xf32> to vector<1x1x1xf32>
    %64 = vector.extract %63[0, 0, 0] : f32 from vector<1x1x1xf32>
    %65 = vector.shape_cast %35 : vector<16x1xf32> to vector<1x16x1xf32>
    %cst_21 = arith.constant dense<0.000000e+00> : vector<1xf32>
    %66 = vector.multi_reduction <add>, %65, %cst_21 [1, 2] : vector<1x16x1xf32> to vector<1xf32>
    %67 = vector.shape_cast %66 : vector<1xf32> to vector<1x1x1xf32>
    %68 = vector.extract %67[0, 0, 0] : f32 from vector<1x1x1xf32>
    %69 = arith.addf %64, %68 : f32
    %70 = math.log %18 : vector<16x128xf32>
    %71 = math.log %13 : vector<16x128xf32>
    %72 = arith.subf %70, %71 : vector<16x128xf32>
    %73 = math.absf %72 : vector<16x128xf32>
    %74 = vector.shape_cast %73 : vector<16x128xf32> to vector<1x16x128xf32>
    %cst_22 = arith.constant dense<0.000000e+00> : vector<1xf32>
    %75 = vector.multi_reduction <add>, %74, %cst_22 [1, 2] : vector<1x16x128xf32> to vector<1xf32>
    %76 = vector.shape_cast %75 : vector<1xf32> to vector<1x1x1xf32>
    %77 = vector.extract %76[0, 0, 0] : f32 from vector<1x1x1xf32>
    %78 = math.log %35 : vector<16x1xf32>
    %79 = math.log %32 : vector<16x1xf32>
    %80 = arith.subf %78, %79 : vector<16x1xf32>
    %81 = math.absf %80 : vector<16x1xf32>
    %82 = vector.shape_cast %81 : vector<16x1xf32> to vector<1x16x1xf32>
    %cst_23 = arith.constant dense<0.000000e+00> : vector<1xf32>
    %83 = vector.multi_reduction <add>, %82, %cst_23 [1, 2] : vector<1x16x1xf32> to vector<1xf32>
    %84 = vector.shape_cast %83 : vector<1xf32> to vector<1x1x1xf32>
    %85 = vector.extract %84[0, 0, 0] : f32 from vector<1x1x1xf32>
    %86 = arith.addf %77, %85 : f32
    %cst_24 = arith.constant 5.000000e-01 : f32
    %87 = arith.mulf %cst_24, %86 : f32
    %88 = tpu.iota {dimensions = array<i32: 0>} : vector<8x128xi32>
    %89 = tpu.iota {dimensions = array<i32: 1>} : vector<8x128xi32>
    %c0_i32 = arith.constant 0 : i32
    %90 = vector.broadcast %c0_i32 : i32 to vector<8x128xi32>
    %91 = arith.cmpi eq, %88, %90 : vector<8x128xi32>
    %c0_i32_25 = arith.constant 0 : i32
    %92 = vector.broadcast %c0_i32_25 : i32 to vector<8x128xi32>
    %93 = arith.cmpi eq, %89, %92 : vector<8x128xi32>
    %94 = arith.andi %91, %93 : vector<8x128xi1>
    %cst_26 = arith.constant 0.000000e+00 : f32
    %95 = vector.broadcast %60 : f32 to vector<8x128xf32>
    %96 = vector.broadcast %cst_26 : f32 to vector<8x128xf32>
    %97 = arith.select %94, %95, %96 : vector<8x128xi1>, vector<8x128xf32>
    %c0_i32_27 = arith.constant 0 : i32
    %98 = vector.broadcast %c0_i32_27 : i32 to vector<8x128xi32>
    %99 = arith.cmpi eq, %88, %98 : vector<8x128xi32>
    %c1_i32 = arith.constant 1 : i32
    %100 = vector.broadcast %c1_i32 : i32 to vector<8x128xi32>
    %101 = arith.cmpi eq, %89, %100 : vector<8x128xi32>
    %102 = arith.andi %99, %101 : vector<8x128xi1>
    %103 = vector.broadcast %69 : f32 to vector<8x128xf32>
    %104 = arith.select %102, %103, %97 : vector<8x128xi1>, vector<8x128xf32>
    %c0_i32_28 = arith.constant 0 : i32
    %105 = vector.broadcast %c0_i32_28 : i32 to vector<8x128xi32>
    %106 = arith.cmpi eq, %88, %105 : vector<8x128xi32>
    %c2_i32 = arith.constant 2 : i32
    %107 = vector.broadcast %c2_i32 : i32 to vector<8x128xi32>
    %108 = arith.cmpi eq, %89, %107 : vector<8x128xi32>
    %109 = arith.andi %106, %108 : vector<8x128xi1>
    %110 = vector.broadcast %87 : f32 to vector<8x128xf32>
    %111 = arith.select %109, %110, %104 : vector<8x128xi1>, vector<8x128xf32>
    %c0_29 = arith.constant 0 : index
    %c0_30 = arith.constant 0 : index
    %112 = vector.load %arg5[%c0_29, %c0_30] : memref<8x128xf32, #tpu.memory_space<vmem>>, vector<8x128xf32>
    tpu.vector_store %arg5[%c0_29, %c0_30], %111 {strides = array<i32>} : memref<8x128xf32, #tpu.memory_space<vmem>>, vector<8x128xf32>,
    return
  }
  func.func @transform_0(%arg0: i32) -> (i32, i32) {
    %c0_i32 = arith.constant 0 : i32
    %c0_i32_0 = arith.constant 0 : i32
    return %arg0, %c0_i32 : i32, i32
  }
  func.func @transform_1(%arg0: i32) -> (i32, i32) {
    %c0_i32 = arith.constant 0 : i32
    %c0_i32_0 = arith.constant 0 : i32
    return %arg0, %c0_i32 : i32, i32
  }
  func.func @transform_2(%arg0: i32) -> (i32, i32) {
    %c0_i32 = arith.constant 0 : i32
    %c0_i32_0 = arith.constant 0 : i32
    %c0_i32_1 = arith.constant 0 : i32
    return %c0_i32, %c0_i32_0 : i32, i32
  }
  func.func @transform_3(%arg0: i32) -> (i32, i32) {
    %c0_i32 = arith.constant 0 : i32
    %c0_i32_0 = arith.constant 0 : i32
    %c0_i32_1 = arith.constant 0 : i32
    return %c0_i32, %c0_i32_0 : i32, i32
  }
  func.func @transform_4(%arg0: i32) -> (i32, i32) {
    %c0_i32 = arith.constant 0 : i32
    %c0_i32_0 = arith.constant 0 : i32
    return %arg0, %c0_i32 : i32, i32
  }
}

module attributes {stable_mosaic.version = 11 : i64} {
  func.func @_stft_loss_kernel(%arg0: i32, %arg1: memref<16x128xbf16, #tpu.memory_space<vmem>>, %arg2: memref<16x128xbf16, #tpu.memory_space<vmem>>, %arg3: memref<128x256xbf16, #tpu.memory_space<vmem>>, %arg4: memref<1x128xf32, #tpu.memory_space<vmem>>, %arg5: memref<8x128xf32, #tpu.memory_space<vmem>>) attributes {dimension_semantics = [#tpu.dimension_semantics<parallel>], iteration_bounds = array<i64: 2>, scalar_prefetch = 0 : i64, scratch_operands = 0 : i64, tpu.core_type = #tpu.core_type<tc>, window_params = [{transform_indices = @transform_0, window_bounds = array<i64: 16, 128>}, {transform_indices = @transform_1, window_bounds = array<i64: 16, 128>}, {pipeline_mode = #tpu.pipeline_mode<synchronous>, transform_indices = @transform_2, window_bounds = array<i64: 128, 256>}, {pipeline_mode = #tpu.pipeline_mode<synchronous>, transform_indices = @transform_3, window_bounds = array<i64: 1, 128>}, {transform_indices = @transform_4, window_bounds = array<i64: 8, 128>}]} {
    %c0 = arith.constant 0 : index
    %c0_0 = arith.constant 0 : index
    %0 = vector.load %arg1[%c0, %c0_0] : memref<16x128xbf16, #tpu.memory_space<vmem>>, vector<16x128xbf16>
    %c0_1 = arith.constant 0 : index
    %c0_2 = arith.constant 0 : index
    %1 = vector.load %arg2[%c0_1, %c0_2] : memref<16x128xbf16, #tpu.memory_space<vmem>>, vector<16x128xbf16>
    %c0_3 = arith.constant 0 : index
    %c0_4 = arith.constant 0 : index
    %2 = vector.load %arg3[%c0_3, %c0_4] : memref<128x256xbf16, #tpu.memory_space<vmem>>, vector<128x256xbf16>
    %cst = arith.constant dense<0.000000e+00> : vector<16x256xf32>
    %3 = tpu.matmul %0, %2, %cst {dimension_numbers = #tpu.dot_dimension_numbers<[1], [0], [0], [1], [0, 0, 1, 1], [], []>} : vector<16x128xbf16>, vector<128x256xbf16>, vector<16x256xf32> -> vector<16x256xf32>
    %cst_5 = arith.constant dense<0.000000e+00> : vector<16x256xf32>
    %4 = tpu.matmul %1, %2, %cst_5 {dimension_numbers = #tpu.dot_dimension_numbers<[1], [0], [0], [1], [0, 0, 1, 1], [], []>} : vector<16x128xbf16>, vector<128x256xbf16>, vector<16x256xf32> -> vector<16x256xf32>
    %5 = vector.extract_strided_slice %3 {offsets = [0, 0], sizes = [16, 128], strides = [1, 1]} : vector<16x256xf32> to vector<16x128xf32>
    %6 = vector.extract_strided_slice %3 {offsets = [0, 128], sizes = [16, 128], strides = [1, 1]} : vector<16x256xf32> to vector<16x128xf32>
    %7 = vector.extract_strided_slice %4 {offsets = [0, 0], sizes = [16, 128], strides = [1, 1]} : vector<16x256xf32> to vector<16x128xf32>
    %8 = vector.extract_strided_slice %4 {offsets = [0, 128], sizes = [16, 128], strides = [1, 1]} : vector<16x256xf32> to vector<16x128xf32>
    %9 = arith.mulf %5, %5 : vector<16x128xf32>
    %10 = arith.mulf %6, %6 : vector<16x128xf32>
    %11 = arith.addf %9, %10 : vector<16x128xf32>
    %cst_6 = arith.constant 1.000000e-07 : f32
    %12 = vector.broadcast %cst_6 : f32 to vector<16x128xf32>
    %13 = arith.maximumf %11, %12 : vector<16x128xf32>
    %14 = arith.mulf %7, %7 : vector<16x128xf32>
    %15 = arith.mulf %8, %8 : vector<16x128xf32>
    %16 = arith.addf %14, %15 : vector<16x128xf32>
    %cst_7 = arith.constant 1.000000e-07 : f32
    %17 = vector.broadcast %cst_7 : f32 to vector<16x128xf32>
    %18 = arith.maximumf %16, %17 : vector<16x128xf32>
    %c0_8 = arith.constant 0 : index
    %c0_9 = arith.constant 0 : index
    %19 = vector.load %arg4[%c0_8, %c0_9] : memref<1x128xf32, #tpu.memory_space<vmem>>, vector<1x128xf32>
    %20 = arith.extf %0 : vector<16x128xbf16> to vector<16x128xf32>
    %21 = vector.broadcast %19 : vector<1x128xf32> to vector<16x128xf32>
    %22 = arith.mulf %20, %21 : vector<16x128xf32>
    %cst_10 = arith.constant dense<0.000000e+00> : vector<16xf32>
    %23 = vector.multi_reduction <add>, %22, %cst_10 [1] : vector<16x128xf32> to vector<16xf32>
    %24 = vector.shape_cast %23 : vector<16xf32> to vector<16x1xf32>
    %25 = arith.extf %1 : vector<16x128xbf16> to vector<16x128xf32>
    %26 = vector.broadcast %19 : vector<1x128xf32> to vector<16x128xf32>
    %27 = arith.mulf %25, %26 : vector<16x128xf32>
    %cst_11 = arith.constant dense<0.000000e+00> : vector<16xf32>
    %28 = vector.multi_reduction <add>, %27, %cst_11 [1] : vector<16x128xf32> to vector<16xf32>
    %29 = vector.shape_cast %28 : vector<16xf32> to vector<16x1xf32>
    %30 = arith.mulf %24, %24 : vector<16x1xf32>
    %cst_12 = arith.constant 1.000000e-07 : f32
    %31 = vector.broadcast %cst_12 : f32 to vector<16x1xf32>
    %32 = arith.maximumf %30, %31 : vector<16x1xf32>
    %33 = arith.mulf %29, %29 : vector<16x1xf32>
    %cst_13 = arith.constant 1.000000e-07 : f32
    %34 = vector.broadcast %cst_13 : f32 to vector<16x1xf32>
    %35 = arith.maximumf %33, %34 : vector<16x1xf32>
    %36 = arith.addf %13, %18 : vector<16x128xf32>
    %37 = arith.mulf %13, %18 : vector<16x128xf32>
    %38 = math.sqrt %37 : vector<16x128xf32>
    %cst_14 = arith.constant 2.000000e+00 : f32
    %39 = vector.broadcast %cst_14 : f32 to vector<16x128xf32>
    %40 = arith.mulf %39, %38 : vector<16x128xf32>
    %41 = arith.subf %36, %40 : vector<16x128xf32>
    %cst_15 = arith.constant 0.000000e+00 : f32
    %42 = vector.broadcast %cst_15 : f32 to vector<16x128xf32>
    %43 = arith.maximumf %41, %42 : vector<16x128xf32>
    %44 = vector.shape_cast %43 : vector<16x128xf32> to vector<1x16x128xf32>
    %cst_16 = arith.constant dense<0.000000e+00> : vector<1xf32>
    %45 = vector.multi_reduction <add>, %44, %cst_16 [1, 2] : vector<1x16x128xf32> to vector<1xf32>
    %46 = vector.shape_cast %45 : vector<1xf32> to vector<1x1x1xf32>
    %47 = vector.extract %46[0, 0, 0] : f32 from vector<1x1x1xf32>
    %48 = arith.addf %32, %35 : vector<16x1xf32>
    %49 = arith.mulf %32, %35 : vector<16x1xf32>
    %50 = math.sqrt %49 : vector<16x1xf32>
    %cst_17 = arith.constant 2.000000e+00 : f32
    %51 = vector.broadcast %cst_17 : f32 to vector<16x1xf32>
    %52 = arith.mulf %51, %50 : vector<16x1xf32>
    %53 = arith.subf %48, %52 : vector<16x1xf32>
    %cst_18 = arith.constant 0.000000e+00 : f32
    %54 = vector.broadcast %cst_18 : f32 to vector<16x1xf32>
    %55 = arith.maximumf %53, %54 : vector<16x1xf32>
    %56 = vector.shape_cast %55 : vector<16x1xf32> to vector<1x16x1xf32>
    %cst_19 = arith.constant dense<0.000000e+00> : vector<1xf32>
    %57 = vector.multi_reduction <add>, %56, %cst_19 [1, 2] : vector<1x16x1xf32> to vector<1xf32>
    %58 = vector.shape_cast %57 : vector<1xf32> to vector<1x1x1xf32>
    %59 = vector.extract %58[0, 0, 0] : f32 from vector<1x1x1xf32>
    %60 = arith.addf %47, %59 : f32
    %61 = vector.shape_cast %18 : vector<16x128xf32> to vector<1x16x128xf32>
    %cst_20 = arith.constant dense<0.000000e+00> : vector<1xf32>
    %62 = vector.multi_reduction <add>, %61, %cst_20 [1, 2] : vector<1x16x128xf32> to vector<1xf32>
    %63 = vector.shape_cast %62 : vector<1xf32> to vector<1x1x1xf32>
    %64 = vector.extract %63[0, 0, 0] : f32 from vector<1x1x1xf32>
    %65 = vector.shape_cast %35 : vector<16x1xf32> to vector<1x16x1xf32>
    %cst_21 = arith.constant dense<0.000000e+00> : vector<1xf32>
    %66 = vector.multi_reduction <add>, %65, %cst_21 [1, 2] : vector<1x16x1xf32> to vector<1xf32>
    %67 = vector.shape_cast %66 : vector<1xf32> to vector<1x1x1xf32>
    %68 = vector.extract %67[0, 0, 0] : f32 from vector<1x1x1xf32>
    %69 = arith.addf %64, %68 : f32
    %70 = math.log %18 : vector<16x128xf32>
    %71 = math.log %13 : vector<16x128xf32>
    %72 = arith.subf %70, %71 : vector<16x128xf32>
    %73 = math.absf %72 : vector<16x128xf32>
    %74 = vector.shape_cast %73 : vector<16x128xf32> to vector<1x16x128xf32>
    %cst_22 = arith.constant dense<0.000000e+00> : vector<1xf32>
    %75 = vector.multi_reduction <add>, %74, %cst_22 [1, 2] : vector<1x16x128xf32> to vector<1xf32>
    %76 = vector.shape_cast %75 : vector<1xf32> to vector<1x1x1xf32>
    %77 = vector.extract %76[0, 0, 0] : f32 from vector<1x1x1xf32>
    %78 = math.log %35 : vector<16x1xf32>
    %79 = math.log %32 : vector<16x1xf32>
    %80 = arith.subf %78, %79 : vector<16x1xf32>
    %81 = math.absf %80 : vector<16x1xf32>
    %82 = vector.shape_cast %81 : vector<16x1xf32> to vector<1x16x1xf32>
    %cst_23 = arith.constant dense<0.000000e+00> : vector<1xf32>
    %83 = vector.multi_reduction <add>, %82, %cst_23 [1, 2] : vector<1x16x1xf32> to vector<1xf32>
    %84 = vector.shape_cast %83 : vector<1xf32> to vector<1x1x1xf32>
    %85 = vector.extract %84[0, 0, 0] : f32 from vector<1x1x1xf32>
    %86 = arith.addf %77, %85 : f32
    %cst_24 = arith.constant 5.000000e-01 : f32
    %87 = arith.mulf %cst_24, %86 : f32
    %88 = tpu.iota {dimensions = array<i32: 0>} : vector<8x128xi32>
    %89 = tpu.iota {dimensions = array<i32: 1>} : vector<8x128xi32>
    %c0_i32 = arith.constant 0 : i32
    %90 = vector.broadcast %c0_i32 : i32 to vector<8x128xi32>
    %91 = arith.cmpi eq, %88, %90 : vector<8x128xi32>
    %c0_i32_25 = arith.constant 0 : i32
    %92 = vector.broadcast %c0_i32_25 : i32 to vector<8x128xi32>
    %93 = arith.cmpi eq, %89, %92 : vector<8x128xi32>
    %94 = arith.andi %91, %93 : vector<8x128xi1>
    %cst_26 = arith.constant 0.000000e+00 : f32
    %95 = vector.broadcast %60 : f32 to vector<8x128xf32>
    %96 = vector.broadcast %cst_26 : f32 to vector<8x128xf32>
    %97 = arith.select %94, %95, %96 : vector<8x128xi1>, vector<8x128xf32>
    %c0_i32_27 = arith.constant 0 : i32
    %98 = vector.broadcast %c0_i32_27 : i32 to vector<8x128xi32>
    %99 = arith.cmpi eq, %88, %98 : vector<8x128xi32>
    %c1_i32 = arith.constant 1 : i32
    %100 = vector.broadcast %c1_i32 : i32 to vector<8x128xi32>
    %101 = arith.cmpi eq, %89, %100 : vector<8x128xi32>
    %102 = arith.andi %99, %101 : vector<8x128xi1>
    %103 = vector.broadcast %69 : f32 to vector<8x128xf32>
    %104 = arith.select %102, %103, %97 : vector<8x128xi1>, vector<8x128xf32>
    %c0_i32_28 = arith.constant 0 : i32
    %105 = vector.broadcast %c0_i32_28 : i32 to vector<8x128xi32>
    %106 = arith.cmpi eq, %88, %105 : vector<8x128xi32>
    %c2_i32 = arith.constant 2 : i32
    %107 = vector.broadcast %c2_i32 : i32 to vector<8x128xi32>
    %108 = arith.cmpi eq, %89, %107 : vector<8x128xi32>
    %109 = arith.andi %106, %108 : vector<8x128xi1>
    %110 = vector.broadcast %87 : f32 to vector<8x128xf32>
    %111 = arith.select %109, %110, %104 : vector<8x128xi1>, vector<8x128xf32>
    %c0_29 = arith.constant 0 : index
    %c0_30 = arith.constant 0 : index
    %112 = vector.load %arg5[%c0_29, %c0_30] : memref<8x128xf32, #tpu.memory_space<vmem>>, vector<8x128xf32>
    tpu.vector_store %arg5[%c0_29, %c0_30], %111 {strides = array<i32>} : memref<8x128xf32, #tpu.memory_space<vmem>>, vector<8x128xf32>,
    return
  }
  func.func @transform_0(%arg0: i32) -> (i32, i32) {
    %c0_i32 = arith.constant 0 : i32
    %c0_i32_0 = arith.constant 0 : i32
    return %arg0, %c0_i32 : i32, i32
  }
  func.func @transform_1(%arg0: i32) -> (i32, i32) {
    %c0_i32 = arith.constant 0 : i32
    %c0_i32_0 = arith.constant 0 : i32
    return %arg0, %c0_i32 : i32, i32
  }
  func.func @transform_2(%arg0: i32) -> (i32, i32) {
    %c0_i32 = arith.constant 0 : i32
    %c0_i32_0 = arith.constant 0 : i32
    %c0_i32_1 = arith.constant 0 : i32
    return %c0_i32, %c0_i32_0 : i32, i32
  }
  func.func @transform_3(%arg0: i32) -> (i32, i32) {
    %c0_i32 = arith.constant 0 : i32
    %c0_i32_0 = arith.constant 0 : i32
    %c0_i32_1 = arith.constant 0 : i32
    return %c0_i32, %c0_i32_0 : i32, i32
  }
  func.func @transform_4(%arg0: i32) -> (i32, i32) {
    %c0_i32 = arith.constant 0 : i32
    %c0_i32_0 = arith.constant 0 : i32
    return %arg0, %c0_i32 : i32, i32
  }
}

</mosaic_0001>

<bundles_post_ra>
// kernel: tpu_custom_call.1
= control target key start
LH: loop header
LB: loop body
LE: loop exit
PB: predicated region body
PF: predicated region fallthrough
CT: control target
= control target key end

     0   :  { %s1397_s0 = inlined_call_operand.hbm [shape: bf16[32,128], index: 0, kind: input, shape index: {}]   ;;  %s1398_s1 = inlined_call_operand.hbm [shape: bf16[32,128], index: 1, kind: input, shape index: {}]   ;;  %s1399_s2 = inlined_call_operand.hbm [shape: bf16[128,256], index: 2, kind: input, shape index: {}]   ;;  %s1400_s3 = inlined_call_operand.vmem [shape: f32[1,128], index: 3, kind: input, shape index: {}]   ;;  %s1401_s4 = inlined_call_operand.hbm [shape: f32[16,128], index: 4, kind: output, shape index: {}]  }
   0x1   :  { %1402 = sst [smem:[#allocation14_spill]] %s1397_s0 }
   0x2   :  { %1403 = sst [smem:[#allocation15_spill]] %s1399_s2 }
   0x3   :  { %9 = vsyncpa [#allocation3], 0 }
   0x4   :  { %11 = vsyncpa [#allocation3 + $0x1], 0 }
   0x5   :  { %12 = vsyncpa [#allocation6], 0 }
   0x6   :  { %14 = vsyncpa [#allocation6 + $0x1], 0 }
   0x7   :  { %15 = vsyncpa [#allocation4], 0 }
   0x8   :  { %17 = vsyncpa [#allocation4 + $0x1], 0  ;;  %s1199_s15 = smov 0   ;;  %s1201_s16 = smov 0  }
   0x9   :  { %s1203_s17 = smov 0   ;;  %s1205_s18 = smov 0  }
   0xa LB: > { %s1220_s19 = sadd.s32 4294967295, %s1167_s18   ;;  %s789_s20 = sadd.s32 4294967294, %s1167_s18   ;;  %s1167_s18 = sphi %s1205_s18, %s1419_s18   ;;  %s1163_s17 = sphi %s1203_s17, %s1418_s17   ;;  %s1159_s16 = sphi %s1201_s16, %s1417_s16   ;;  %s1155_s15 = sphi %s1199_s15, %s1416_s15  }
   0xb   : > { %p43_p0 = scmp.ne.s32.totalorder %s1159_s16, %s1155_s15  ;;  %p44_p1 = scmp.eq.s32.totalorder %s1220_s19, 0 }
   0xc   : > { %p135_p2 = scmp.eq.s32.totalorder %s1220_s19, 1  ;;  %p141_p3 = scmp.eq.s32.totalorder %s789_s20, 1 }
   0xd   : > { %p1229_p4 = por %p44_p1, %p43_p0  ;;  %p790_p5 = scmp.ge.s32.totalorder %s1167_s18, 1 }
   0xe   : > { %p1234_p6 = por %p141_p3, %p43_p0  ;;  %p148_p7 = scmp.lt.s32.totalorder %s1167_s18, 3 }
   0xf   : > { %s1406_s2 = sld [smem:[#allocation15_spill]]  ;;  %s1169_s27 = smov [#allocation7]  }
  0x10   : > { %p1242_p8 = pnand %p790_p5, %p148_p7  ;;  %s161_s28 = sshll.u32 %s1169_s27, 4  ;;  %s162_s28 = int_to_ptr.vmem [resolvable:$true] %s161_s28 }
  0x11   : > { %s1252_s29 = sadd.s32 1, %s1167_s18   ;;  %s1170_s30 = smov 128  }
  0x12   : > { %p922_p9 = pneg %p1242_p8  ;;  %s1171_s5 = smov 8  }
  0x13   : > { %s27_s6 = ssub.s32 %s1167_s18, %s1252_s29  ;;  %s30_s7 = sadd.s32 1, %s1163_s17 }
  0x14   : > { %p923_p10 = pnand %p922_p9, %p44_p1  ;;  %p28_p12 = scmp.eq.s32.totalorder %s27_s6, 0 }
  0x15   : > { %s159_s25 = sshll.u32 %s1406_s2, 4  ;;  %p37_p13 = scmp.ne.s32.totalorder %s1163_s17, %s1159_s16  ;;  %s160_s25 = int_to_ptr.hbm [resolvable:$true] %s159_s25 }
  0x16   : > { %925 = dma.hbm_to_vmem [thread:$0]  (!%p923_p10), %s160_s25, 2048, %s162_s28, [#allocation6], %s1170_s30, %s1170_s30, %s1171_s5  }
  0x17   : > { %p38_p0 = scmp.eq.s32.totalorder %s1167_s18, 0  ;;  %p938_p3 = scmp.lt.s32.totalorder %s1167_s18, 2 }
  0x18   : > { %s1262_s8 = scalar_select %p28_p12, %s1163_s17, %s30_s7  }
  0x19   : > { %p39_p5 = por %p38_p0, %p37_p13  ;;  %p1266_p7 = por %p135_p2, %p37_p13 }
  0x1a   : > { %1408 = sst [smem:[#allocation13_spill]] %s1262_s8  ;;  %s178_s10 = sand.u32 1, %s1163_s17  }
  0x1b   : > { %s880_s11 = sshll.u32 %s1167_s18, 3  ;;  %s1272_s12 = sshll.u32 %s178_s10, 3 }
  0x1c   : > { %s1410_s0 = sld [smem:[#allocation14_spill]]  ;;  %s182_s24 = scalar_lea.vmem [#allocation2], %s1272_s12 }
  0x1d   : > { %s190_s25 = sshll.u32 %s182_s24, 4  ;;  %p1280_p9 = pnand %p938_p3, %p39_p5  ;;  %s191_s25 = int_to_ptr.vmem [resolvable:$true] %s190_s25 }
  0x1e   : > { %s209_s5 = scalar_lea.hbm %s1398_s1, %s880_s11  ;;  %s179_s6 = scalar_lea.sflag [#allocation3], %s178_s10 }
  0x1f   : > { %p1037_p10 = pneg %p1280_p9 }
  0x22   : > { %s187_s20 = scalar_lea.hbm %s1410_s0, %s880_s11  ;;  %s1040_s24 = scalar_lea.hbm %s1410_s0, 16 }
  0x23   : > { %s188_s23 = sshll.u32 %s187_s20, 4  ;;  %s189_s23 = int_to_ptr.hbm [resolvable:$true] %s188_s23 }
  0x24   : > { %s1033_s7 = sshra.s32 %s189_s23, 4  ;;  %s1034_s7 = int_to_ptr.hbm [resolvable:$true] %s1033_s7 }
  0x25   : > { %s1035_s13 = scalar_lea.hbm %s1034_s7, 8  ;;  %p1041_p0 = scmp.lt.s32.totalorder %s1034_s7, %s1410_s0 }
  0x26   : > { %p1036_p2 = scmp.ne.s32.totalorder %s1034_s7, %s1035_s13  ;;  %p1042_p3 = scmp.lt.s32.totalorder %s1040_s24, %s1035_s13 }
  0x28   : > { %p1038_p12 = pnand %p1037_p10, %p1036_p2  ;;  %p1043_p5 = por %p1042_p3, %p1041_p0 }
  0x2a   : > { %p1039_p13 = pneg %p1038_p12 }
  0x2c   : > { %p1044_p11 = pnand %p1043_p5, %p1039_p13 }
  0x2e   : > { %1047 = shalt.err (!%p1044_p11)
}
  0x2f   : > { %s1172_s10 = smov 64   ;;  %s1173_s11 = smov 4  }
  0x30   : > { %929 = dma.hbm_to_vmem [thread:$0]  (!%p1280_p9), %s189_s23, 128, %s191_s25, %s179_s6, %s1172_s10, %s1172_s10, %s1173_s11  }
  0x31   : > { %s210_s30 = sshll.u32 %s209_s5, 4  ;;  %s204_s8 = scalar_lea.vmem [#allocation5], %s1272_s12  ;;  %s211_s30 = int_to_ptr.hbm [resolvable:$true] %s210_s30 }
  0x32   : > { %s212_s14 = sshll.u32 %s204_s8, 4  ;;  %s200_s20 = sand.u32 1, %s1167_s18   ;;  %s213_s14 = int_to_ptr.vmem [resolvable:$true] %s212_s14 }
  0x33   : > { %s201_s2 = scalar_lea.sflag [#allocation6], %s200_s20  ;;  %s1063_s7 = sshra.s32 %s211_s30, 4  ;;  %s1064_s7 = int_to_ptr.hbm [resolvable:$true] %s1063_s7 }
  0x34   : > { %s1065_s13 = scalar_lea.hbm %s1064_s7, 8  ;;  %s1070_s0 = scalar_lea.hbm %s1398_s1, 16 }
  0x35   : > { %p1066_p2 = scmp.ne.s32.totalorder %s1064_s7, %s1065_s13  ;;  %p1071_p13 = scmp.lt.s32.totalorder %s1064_s7, %s1398_s1 }
  0x36   : > { %p1072_p0 = scmp.lt.s32.totalorder %s1070_s0, %s1065_s13 }
  0x37   : > { %p1068_p11 = pnand %p1066_p2, %p1037_p10 }
  0x38   : > { %p1073_p3 = por %p1072_p0, %p1071_p13 }
  0x39   : > { %p1069_p12 = pneg %p1068_p11 }
  0x3b   : > { %p1074_p5 = pnand %p1073_p3, %p1069_p12 }
  0x3d   : > { %1077 = shalt.err (!%p1074_p5)
}
  0x3e   : > { %932 = dma.hbm_to_vmem [thread:$0]  (!%p1280_p9), %s211_s30, 128, %s213_s14, %s201_s2, %s1172_s10, %s1172_s10, %s1173_s11  }
  0x3f   : > { %224 = sbr.rel (%p1242_p8) target bundleno = 483 (0x1e3), region = 36  ;;  %s1316_s8 = sand.u32 (!%p1242_p8), 1, %s1159_s16  }
  0x40   : > { %s1319_s12 = sshll.u32 (!%p1242_p8), %s1316_s8, 3  ;;  %s227_s5 = scalar_lea.sflag (!%p1242_p8), [#allocation3], %s1316_s8 }
  0x41   : > { %s230_s0 = scalar_lea.vmem (!%p1242_p8), [#allocation2], %s1319_s12 }
  0x44   : > { %1138 = dma.done.wait (%p1229_p4), %s227_s5, 128  }
  0x45   : > { %1140 = vsyncadd (%p1229_p4), %s227_s5, 4294967168  ;;  %s236_s26 = sand.u32 1, %s1220_s19   ;;  %s240_s6 = scalar_lea.vmem [#allocation5], %s1319_s12 }
  0x46   : > { %s237_s27 = scalar_lea.sflag [#allocation6], %s236_s26 }
  0x47   : > { %1142 = dma.done.wait (%p1229_p4), %s237_s27, 128  }
  0x48   : > { %1144 = vsyncadd (%p1229_p4), %s237_s27, 4294967168 }
  0x49   : > { %1146 = dma.done.wait (%p44_p1), [#allocation6], 2048  }
  0x4a   : > { %1148 = vsyncadd (%p44_p1), [#allocation6], 4294965248  ;;  %v866_v0 = vld [vmem:[#allocation7 + $0x70] sm:$0xf]  ;;  %v899_v1 = vld [vmem:[#allocation7 + $0x74] sm:$0xf0] }
  0x4b   : > { %v898_v2 = vld [vmem:[#allocation7 + $0x74] sm:$0xf]  ;;  %v867_v3 = vor.u32 %v899_v1, %v866_v0  ;;  %v868_v4 = vld [vmem:[#allocation7 + $0x78] sm:$0xf0]  ;;  %v978_v7 = vld [vmem:[%s1400_s3] ss:$0 sm:$0xff] }
  0x4c   : > { %v280_v5 = vld [vmem:[%s240_s6] sm:$0xff]   ;;  %v871_v6 = vor.u32 %v898_v2, %v868_v4  ;;  %v278_v9 = vld [vmem:[%s230_s0] sm:$0xff]   ;;  %vm568_vm0 = vcmask 7168   ;;  %s877_s7 = sshll.u32 %s1220_s19, 3  ;;  %s275_s19 = scalar_lea.vmem [#allocation8], %s1319_s12 }
  0x4d   : > { %v474_v8 = vunpack.c.l.bf16 %v280_v5  ;;  %v858_v10 = vld [vmem:[#allocation7 + $0x60] sm:$0xf]  ;;  %384 = vmatpush.bf16.msra.mxu0 %v867_v3  ;;  %418 = vmatpush.bf16.msra.mxu2 %v867_v3  ;;  %v463_v11 = vunpack.c.l.bf16 %v278_v9  ;;  %v897_v12 = vld [vmem:[#allocation7 + $0x64] sm:$0xf0]  ;;  %v896_v13 = vld [vmem:[#allocation7 + $0x64] sm:$0xf]  ;;  %v475_v23 = vunpack.c.h.bf16 %v280_v5  ;;  %v464_v25 = vunpack.c.h.bf16 %v278_v9  ;;  %s682_s25 = scalar_lea.hbm %s1401_s4, %s877_s7 }
  0x4e   : > { %v860_v14 = vld [vmem:[#allocation7 + $0x68] sm:$0xf0]  ;;  %398 = vmatpush.bf16.msra.mxu1 %v871_v6  ;;  %432 = vmatpush.bf16.msra.mxu3 %v871_v6  ;;  %v859_v16 = vor.u32 %v897_v12, %v858_v10  ;;  %v850_v18 = vld [vmem:[#allocation7 + $0x50] sm:$0xf]  ;;  %v895_v19 = vld [vmem:[#allocation7 + $0x54] sm:$0xf0] }
  0x4f   : > { %v476_v15 = vmul.f32 %v978_v7, %v474_v8  ;;  %v863_v17 = vor.u32 %v896_v13, %v860_v14  ;;  %v468_v20 = vmul.f32 %v978_v7, %v463_v11  ;;  %v894_v21 = vld [vmem:[#allocation7 + $0x54] sm:$0xf]  ;;  %v852_v22 = vld [vmem:[#allocation7 + $0x58] sm:$0xf0]  ;;  %v851_v24 = vor.u32 %v895_v19, %v850_v18  ;;  %v842_v27 = vld [vmem:[#allocation7 + $0x40] sm:$0xf] }
  0x50   : > { %v855_v26 = vor.u32 %v894_v21, %v852_v22  ;;  %v893_v28 = vld [vmem:[#allocation7 + $0x44] sm:$0xf0]  ;;  %v892_v29 = vld [vmem:[#allocation7 + $0x44] sm:$0xf]  ;;  %v844_v30 = vld [vmem:[#allocation7 + $0x48] sm:$0xf0]  ;;  %v477_v31 = vmul.f32 %v978_v7, %v475_v23  ;;  %v469_v32 = vmul.f32 %v978_v7, %v464_v25 }
  0x51   : > { %478 = vadd.xlane.f32.xlu1 %v476_v15  ;;  %470 = vadd.xlane.f32.xlu0 %v468_v20  ;;  %v843_v33 = vor.u32 %v893_v28, %v842_v27  ;;  %v847_v34 = vor.u32 %v892_v29, %v844_v30  ;;  %v834_v35 = vld [vmem:[#allocation7 + $0x30] sm:$0xf]  ;;  %v891_v36 = vld [vmem:[#allocation7 + $0x34] sm:$0xf0]  ;;  %v890_v37 = vld [vmem:[#allocation7 + $0x34] sm:$0xf] }
  0x52   : > { %385 = vmatpush.bf16.msra.mxu0 %v859_v16  ;;  %399 = vmatpush.bf16.msra.mxu1 %v863_v17  ;;  %v836_v38 = vld [vmem:[#allocation7 + $0x38] sm:$0xf0]  ;;  %v835_v39 = vor.u32 %v891_v36, %v834_v35  ;;  %v826_v41 = vld [vmem:[#allocation7 + $0x20] sm:$0xf]  ;;  %v889_v42 = vld [vmem:[#allocation7 + $0x24] sm:$0xf0] }
  0x53   : > { %419 = vmatpush.bf16.msra.mxu2 %v859_v16  ;;  %433 = vmatpush.bf16.msra.mxu3 %v863_v17  ;;  %v839_v40 = vor.u32 %v890_v37, %v836_v38  ;;  %v888_v43 = vld [vmem:[#allocation7 + $0x24] sm:$0xf]  ;;  %v828_v44 = vld [vmem:[#allocation7 + $0x28] sm:$0xf0]  ;;  %v827_v45 = vor.u32 %v889_v42, %v826_v41  ;;  %v818_v47 = vld [vmem:[#allocation7 + $0x10] sm:$0xf] }
  0x54   : > { %v831_v46 = vor.u32 %v888_v43, %v828_v44  ;;  %v887_v48 = vld [vmem:[#allocation7 + $0x14] sm:$0xf0]  ;;  %v886_v49 = vld [vmem:[#allocation7 + $0x14] sm:$0xf]  ;;  %v820_v50 = vld [vmem:[#allocation7 + $0x18] sm:$0xf0] }
  0x55   : > { %v819_v51 = vor.u32 %v887_v48, %v818_v47  ;;  %v823_v52 = vor.u32 %v886_v49, %v820_v50  ;;  %v810_v53 = vld [vmem:[#allocation7] sm:$0xf]  ;;  %v885_v54 = vld [vmem:[#allocation7 + $0x4] sm:$0xf0]  ;;  %v884_v55 = vld [vmem:[#allocation7 + $0x4] sm:$0xf] }
  0x56   : > { %386 = vmatpush.bf16.msra.mxu0 %v851_v24  ;;  %400 = vmatpush.bf16.msra.mxu1 %v855_v26  ;;  %v812_v56 = vld [vmem:[#allocation7 + $0x8] sm:$0xf0]  ;;  %v811_v57 = vor.u32 %v885_v54, %v810_v53  ;;  %v883_v60 = vld [vmem:[%s240_s6] sm:$0xff]  ;;  %s684_s26 = sshll.u32 %s275_s19, 4  ;;  %s686_s27 = sshll.u32 %s682_s25, 4  ;;  %s685_s26 = int_to_ptr.vmem [resolvable:$true] %s684_s26  ;;  %s687_s27 = int_to_ptr.hbm [resolvable:$true] %s686_s27 }
  0x57   : > { %420 = vmatpush.bf16.msra.mxu2 %v851_v24  ;;  %434 = vmatpush.bf16.msra.mxu3 %v855_v26  ;;  %v815_v58 = vor.u32 %v884_v55, %v812_v56  ;;  %v882_v59 = vld [vmem:[%s230_s0] sm:$0xff]  ;;  %s672_s10 = scalar_lea.sflag [#allocation4], %s1316_s8  ;;  %s1107_s11 = sshra.s32 %s687_s27, 4  ;;  %s1108_s11 = int_to_ptr.hbm [resolvable:$true] %s1107_s11 }
  0x58   : > { %p1114_p9 = scmp.lt.s32.totalorder %s1108_s11, %s1401_s4 }
  0x59   : > { %480 = vadd.xlane.f32.xlu1 %v477_v31  ;;  %472 = vadd.xlane.f32.xlu0 %v469_v32 }
  0x5a   : > { %387 = vmatpush.bf16.msra.mxu0 %v843_v33  ;;  %401 = vmatpush.bf16.msra.mxu1 %v847_v34 }
  0x5b   : > { %421 = vmatpush.bf16.msra.mxu2 %v843_v33  ;;  %435 = vmatpush.bf16.msra.mxu3 %v847_v34 }
  0x5e   : > { %388 = vmatpush.bf16.msra.mxu0 %v835_v39  ;;  %402 = vmatpush.bf16.msra.mxu1 %v839_v40 }
  0x5f   : > { %422 = vmatpush.bf16.msra.mxu2 %v835_v39  ;;  %436 = vmatpush.bf16.msra.mxu3 %v839_v40 }
  0x62   : > { %389 = vmatpush.bf16.msra.mxu0 %v827_v45  ;;  %403 = vmatpush.bf16.msra.mxu1 %v831_v46 }
  0x63   : > { %423 = vmatpush.bf16.msra.mxu2 %v827_v45  ;;  %437 = vmatpush.bf16.msra.mxu3 %v831_v46 }
  0x66   : > { %390 = vmatpush.bf16.msra.mxu0 %v819_v51  ;;  %404 = vmatpush.bf16.msra.mxu1 %v823_v52 }
  0x67   : > { %424 = vmatpush.bf16.msra.mxu2 %v819_v51  ;;  %438 = vmatpush.bf16.msra.mxu3 %v823_v52 }
  0x6a   : > { %391 = vmatpush.bf16.msra.mxu0 %v811_v57  ;;  %405 = vmatpush.bf16.msra.mxu1 %v815_v58 }
  0x6b   : > { %425 = vmatpush.bf16.msra.mxu2 %v811_v57  ;;  %439 = vmatpush.bf16.msra.mxu3 %v815_v58 }
  0x6d   : > { %392 = vmatmul.bf16.vlgmr.msra.gmra.mxu0 %v882_v59  ;;  %406 = vmatmul.bf16.vlgmr.msra.gmra.mxu1 %v882_v59 }
  0x6e   : > { %426 = vmatmul.bf16.vlgmr.msra.gmra.mxu2 %v883_v60  ;;  %440 = vmatmul.bf16.vlgmr.msra.gmra.mxu3 %v883_v60 }
  0xc4   : > { %v479_v61 = vpop.xlane.xlu1 %478  ;;  %v471_v63 = vpop.xlane.xlu0 %470 }
  0xc5   : > { %v486_v62 = vmul.f32 %v479_v61, %v479_v61  ;;  %v482_v0 = vmul.f32 %v471_v63, %v471_v63 }
  0xc7   : > { %v488_v1 = vmax.f32 %v486_v62, 1e-07  ;;  %v484_v2 = vmax.f32 %v482_v0, 1e-07 }
  0xc9   : > { %v536_v3 = vmul.f32 %v488_v1, %v484_v2  ;;  %v592_v9 = vsel %vm568_vm0, %v488_v1, 0.0  ;;  %v534_v28 = vadd.f32 %v488_v1, %v484_v2 }
  0xcb   : > { %979 = vrsqrt.f32 %v536_v3  ;;  %vm545_vm1 = vcmp.eq.f32.partialorder %v536_v3, inf  ;;  %v548_v22 = vand.u32 2147483648, %v536_v3  ;;  %vm547_vm2 = vcmp.eq.f32.partialorder %v536_v3, 0.0 }
  0xcc   : > { %v481_v4 = vpop.xlane.xlu1 %480  ;;  %v473_v6 = vpop.xlane.xlu0 %472 }
  0xcd   : > { %v487_v5 = vmul.f32 %v481_v4, %v481_v4  ;;  %v483_v7 = vmul.f32 %v473_v6, %v473_v6 }
  0xcf   : > { %v489_v8 = vmax.f32 %v487_v5, 1e-07  ;;  %v485_v10 = vmax.f32 %v483_v7, 1e-07 }
  0xd1   : > { %v593_v11 = vsel %vm568_vm0, %v489_v8, 0.0  ;;  %v980_v12 = vpop.eup %979  ;;  %v537_v13 = vmul.f32 %v489_v8, %v485_v10  ;;  %v535_v35 = vadd.f32 %v489_v8, %v485_v10 }
  0xd2   : > { %v594_v14 = vadd.f32 %v593_v11, %v592_v9  ;;  %v539_v15 = vmul.f32 %v980_v12, %v536_v3 }
  0xd3   : > { %981 = vrsqrt.f32 %v537_v13  ;;  %vm557_vm3 = vcmp.eq.f32.partialorder %v537_v13, inf  ;;  %v560_v32 = vand.u32 2147483648, %v537_v13  ;;  %vm559_vm4 = vcmp.eq.f32.partialorder %v537_v13, 0.0 }
  0xd4   : > { %595 = vadd.xlane.f32.xlu1 %v594_v14  ;;  %v540_v16 = vmul.f32 %v980_v12, %v539_v15  ;;  %983 = vlog2.f32 %v484_v2 }
  0xd5   : > { %985 = vlog2.f32 %v488_v1 }
  0xd6   : > { %v541_v17 = vmul.f32 0.5, %v540_v16  ;;  %987 = vlog2.f32 %v489_v8 }
  0xd7   : > { %989 = vlog2.f32 %v485_v10 }
  0xd8   : > { %v542_v18 = vsub.f32 1.5, %v541_v17 }
  0xd9   : > { %v982_v19 = vpop.eup %981 }
  0xda   : > { %v543_v20 = vmul.f32 %v980_v12, %v542_v18  ;;  %v551_v21 = vmul.f32 %v982_v19, %v537_v13  ;;  %v984_v54 = vpop.eup %983 }
  0xdb   : > { %v986_v57 = vpop.eup %985  ;;  %v632_v7 = vmul.f32 0.6931472, %v984_v54 }
  0xdc   : > { %v544_v23 = vmul.f32 %v543_v20, %v536_v3  ;;  %v552_v24 = vmul.f32 %v982_v19, %v551_v21  ;;  %v988_v60 = vpop.eup %987 }
  0xdd   : > { %v990_v61 = vpop.eup %989  ;;  %v630_v6 = vmul.f32 0.6931472, %v988_v60 }
  0xde   : > { %v546_v25 = vsel %vm545_vm1, %v536_v3, %v544_v23  ;;  %v553_v26 = vmul.f32 0.5, %v552_v24  ;;  %v628_v3 = vmul.f32 0.6931472, %v986_v57  ;;  %v634_v8 = vmul.f32 0.6931472, %v990_v61 }
  0xdf   : > { %v549_v27 = vsel %vm547_vm2, %v548_v22, %v546_v25 }
  0xe0   : > { %v554_v29 = vsub.f32 1.5, %v553_v26  ;;  %v562_v30 = vmul.f32 2.0, %v549_v27  ;;  %v635_v12 = vsub.f32 %v628_v3, %v632_v7 }
  0xe2   : > { %v555_v31 = vmul.f32 %v982_v19, %v554_v29  ;;  %v564_v34 = vsub.f32 %v534_v28, %v562_v30  ;;  %v637_v19 = vand.u32 2147483647, %v635_v12 }
  0xe4   : > { %v556_v33 = vmul.f32 %v555_v31, %v537_v13  ;;  %v566_v39 = vmax.f32 %v564_v34, 0.0  ;;  %v639_v23 = vsel %vm568_vm0, %v637_v19, 0.0 }
  0xe6   : > { %v558_v36 = vsel %vm557_vm3, %v537_v13, %v556_v33  ;;  %v569_v46 = vsel %vm568_vm0, %v566_v39, 0.0  ;;  %v636_v13 = vsub.f32 %v630_v6, %v634_v8 }
  0xe7   : > { %v561_v37 = vsel %vm559_vm4, %v560_v32, %v558_v36 }
  0xe8   : > { %v563_v38 = vmul.f32 2.0, %v561_v37  ;;  %v638_v20 = vand.u32 2147483647, %v636_v13 }
  0xea   : > { %v393_v40 = vpop.f32.mrf.mxu0  ;;  %v407_v41 = vpop.f32.mrf.mxu1  ;;  %v565_v42 = vsub.f32 %v535_v35, %v563_v38  ;;  %v640_v24 = vsel %vm568_vm0, %v638_v20, 0.0 }
  0xeb   : > { %v446_v43 = vmul.f32 %v393_v40, %v393_v40  ;;  %v448_v44 = vmul.f32 %v407_v41, %v407_v41  ;;  %v641_v28 = vadd.f32 %v640_v24, %v639_v23 }
  0xec   : > { %v567_v45 = vmax.f32 %v565_v42, 0.0 }
  0xed   : > { %v450_v49 = vadd.f32 %v448_v44, %v446_v43 }
  0xee   : > { %v570_v47 = vsel %vm568_vm0, %v567_v45, 0.0 }
  0xef   : > { %v571_v48 = vadd.f32 %v570_v47, %v569_v46  ;;  %v452_v58 = vmax.f32 %v450_v49, 1e-07 }
  0xf1   : > { %v427_v50 = vpop.f32.mrf.mxu2  ;;  %v441_v52 = vpop.f32.mrf.mxu3  ;;  %572 = vadd.xlane.f32.xlu2 %v571_v48 }
  0xf2   : > { %v454_v51 = vmul.f32 %v427_v50, %v427_v50  ;;  %v456_v53 = vmul.f32 %v441_v52, %v441_v52  ;;  %v395_v55 = vpop.f32.mrf.mxu0  ;;  %v409_v56 = vpop.f32.mrf.mxu1 }
  0xf3   : > { %v447_v63 = vmul.f32 %v395_v55, %v395_v55  ;;  %v449_v0 = vmul.f32 %v409_v56, %v409_v56 }
  0xf4   : > { %v458_v59 = vadd.f32 %v456_v53, %v454_v51 }
  0xf5   : > { %v451_v9 = vadd.f32 %v449_v0, %v447_v63 }
  0xf6   : > { %v460_v62 = vmax.f32 %v458_v59, 1e-07 }
  0xf7   : > { %v453_v14 = vmax.f32 %v451_v9, 1e-07 }
  0xf8   : > { %v492_v1 = vmul.f32 %v460_v62, %v452_v58  ;;  %v490_v43 = vadd.f32 %v460_v62, %v452_v58 }
  0xf9   : > { %v429_v2 = vpop.f32.mrf.mxu2  ;;  %v443_v5 = vpop.f32.mrf.mxu3 }
  0xfa   : > { %v455_v4 = vmul.f32 %v429_v2, %v429_v2  ;;  %v457_v10 = vmul.f32 %v443_v5, %v443_v5  ;;  %991 = vrsqrt.f32 %v492_v1  ;;  %vm501_vm5 = vcmp.eq.f32.partialorder %v492_v1, inf }
  0xfb   : > { %v504_v35 = vand.u32 2147483648, %v492_v1  ;;  %vm503_vm6 = vcmp.eq.f32.partialorder %v492_v1, 0.0 }
  0xfc   : > { %v459_v11 = vadd.f32 %v457_v10, %v455_v4 }
  0xfe   : > { %v461_v15 = vmax.f32 %v459_v11, 1e-07 }
 0x100   : > { %v992_v16 = vpop.eup %991  ;;  %v493_v17 = vmul.f32 %v461_v15, %v453_v14  ;;  %v582_v18 = vadd.f32 %v461_v15, %v460_v62  ;;  %v491_v48 = vadd.f32 %v461_v15, %v453_v14 }
 0x101   : > { %v495_v21 = vmul.f32 %v992_v16, %v492_v1 }
 0x102   : > { %583 = vadd.xlane.f32.xlu0 %v582_v18  ;;  %993 = vrsqrt.f32 %v493_v17  ;;  %vm513_vm7 = vcmp.eq.f32.partialorder %v493_v17, inf  ;;  %v516_v41 = vand.u32 2147483648, %v493_v17  ;;  %vm515_vm8 = vcmp.eq.f32.partialorder %v493_v17, 0.0 }
 0x103   : > { %v496_v22 = vmul.f32 %v992_v16, %v495_v21  ;;  %995 = vlog2.f32 %v452_v58 }
 0x104   : > { %997 = vlog2.f32 %v461_v15 }
 0x105   : > { %v497_v25 = vmul.f32 0.5, %v496_v22  ;;  %999 = vlog2.f32 %v460_v62 }
 0x106   : > { %1001 = vlog2.f32 %v453_v14 }
 0x107   : > { %v498_v26 = vsub.f32 1.5, %v497_v25 }
 0x108   : > { %v994_v27 = vpop.eup %993 }
 0x109   : > { %v499_v29 = vmul.f32 %v992_v16, %v498_v26  ;;  %v507_v30 = vmul.f32 %v994_v27, %v493_v17  ;;  %v996_v42 = vpop.eup %995 }
 0x10a   : > { %642 = vadd.xlane.f32.xlu0 %v641_v28  ;;  %v998_v45 = vpop.eup %997  ;;  %v610_v54 = vmul.f32 0.6931472, %v996_v42 }
 0x10b   : > { %v500_v31 = vmul.f32 %v499_v29, %v492_v1  ;;  %v508_v32 = vmul.f32 %v994_v27, %v507_v30  ;;  %v1000_v47 = vpop.eup %999  ;;  %v608_v53 = vmul.f32 0.6931472, %v998_v45 }
 0x10c   : > { %v1002_v51 = vpop.eup %1001  ;;  %v606_v57 = vmul.f32 0.6931472, %v1000_v47 }
 0x10d   : > { %v502_v33 = vsel %vm501_vm5, %v492_v1, %v500_v31  ;;  %v509_v34 = vmul.f32 0.5, %v508_v32  ;;  %v612_v59 = vmul.f32 0.6931472, %v1002_v51 }
 0x10e   : > { %v505_v37 = vsel %vm503_vm6, %v504_v35, %v502_v33  ;;  %v613_v58 = vsub.f32 %v606_v57, %v610_v54 }
 0x10f   : > { %v510_v36 = vsub.f32 1.5, %v509_v34  ;;  %v518_v40 = vmul.f32 2.0, %v505_v37  ;;  %v614_v61 = vsub.f32 %v608_v53, %v612_v59 }
 0x110   : > { %v615_v63 = vand.u32 2147483647, %v613_v58 }
 0x111   : > { %v511_v38 = vmul.f32 %v994_v27, %v510_v36  ;;  %v520_v50 = vsub.f32 %v490_v43, %v518_v40  ;;  %v616_v62 = vand.u32 2147483647, %v614_v61  ;;  %v653_v43 = vlaneseq }
 0x113   : > { %v512_v39 = vmul.f32 %v511_v38, %v493_v17  ;;  %v522_v55 = vmax.f32 %v520_v50, 0.0  ;;  %v617_v0 = vadd.f32 %v616_v62, %v615_v63  ;;  %v656_v45 = vand.u32 127, %v653_v43 }
 0x115   : > { %v514_v44 = vsel %vm513_vm7, %v493_v17, %v512_v39  ;;  %vm658_vm10 = vcmp.eq.s32.totalorder %v656_v45, 0  ;;  %vm662_vm12 = vcmp.eq.s32.totalorder %v656_v45, 1  ;;  %vm666_vm13 = vcmp.eq.s32.totalorder %v656_v45, 2 }
 0x116   : > { %v517_v46 = vsel %vm515_vm8, %v516_v41, %v514_v44  ;;  %v654_v44 = vshrl.u32 %v653_v43, 7 }
 0x117   : > { %v519_v49 = vmul.f32 2.0, %v517_v46 }
 0x118   : > { %vm657_vm9 = vcmp.eq.s32.totalorder %v654_v44, 0 }
 0x119   : > { %v521_v52 = vsub.f32 %v491_v48, %v519_v49  ;;  %vm1356_vm11 = vmand %vm657_vm9, %vm658_vm10 }
 0x11a   : > { %vm663_vm14 = vmand %vm657_vm9, %vm662_vm12 }
 0x11b   : > { %v523_v56 = vmax.f32 %v521_v52, 0.0  ;;  %vm667_vm15 = vmand %vm657_vm9, %vm666_vm13 }
 0x11d   : > { %v524_v60 = vadd.f32 %v523_v56, %v522_v55 }
 0x11f   : > { %525 = vadd.xlane.f32.xlu2 %v524_v60 }
 0x127   : > { %618 = vadd.xlane.f32.xlu2 %v617_v0 }
 0x147   : > { %v596_v3 = vpop.xlane.xlu1 %595 }
 0x148   : > { %v597_v6 = vrot.slane %v596_v3, 4 }
 0x14a   : > { %v598_v10 = vadd.f32 %v597_v6, %v596_v3 }
 0x14c   : > { %v599_v16 = vrot.slane %v598_v10, 2 }
 0x14e   : > { %v600_v22 = vadd.f32 %v599_v16, %v598_v10 }
 0x150   : > { %v601_v30 = vrot.slane %v600_v22, 1 }
 0x152   : > { %v602_v37 = vadd.f32 %v601_v30, %v600_v22 }
 0x164   : > { %v573_v2 = vpop.xlane.xlu2 %572 }
 0x165   : > { %v574_v4 = vrot.slane %v573_v2, 4 }
 0x167   : > { %v575_v7 = vadd.f32 %v574_v4, %v573_v2 }
 0x169   : > { %v576_v11 = vrot.slane %v575_v7, 2 }
 0x16b   : > { %v577_v19 = vadd.f32 %v576_v11, %v575_v7 }
 0x16d   : > { %v578_v26 = vrot.slane %v577_v19, 1 }
 0x16f   : > { %v579_v34 = vadd.f32 %v578_v26, %v577_v19 }
 0x175   : > { %v584_v1 = vpop.xlane.xlu0 %583 }
 0x176   : > { %v585_v5 = vrot.slane %v584_v1, 4 }
 0x178   : > { %v586_v8 = vadd.f32 %v585_v5, %v584_v1 }
 0x17a   : > { %v587_v14 = vrot.slane %v586_v8, 2 }
 0x17c   : > { %v588_v21 = vadd.f32 %v587_v14, %v586_v8 }
 0x17d   : > { %v643_v9 = vpop.xlane.xlu0 %642 }
 0x17e   : > { %v644_v12 = vrot.slane %v643_v9, 4  ;;  %v589_v29 = vrot.slane %v588_v21, 1 }
 0x180   : > { %v645_v18 = vadd.f32 %v644_v12, %v643_v9  ;;  %v590_v36 = vadd.f32 %v589_v29, %v588_v21 }
 0x182   : > { %v646_v24 = vrot.slane %v645_v18, 2 }
 0x184   : > { %v647_v33 = vadd.f32 %v646_v24, %v645_v18 }
 0x186   : > { %v648_v39 = vrot.slane %v647_v33, 1 }
 0x188   : > { %v649_v42 = vadd.f32 %v648_v39, %v647_v33 }
 0x192   : > { %v526_v13 = vpop.xlane.xlu2 %525 }
 0x193   : > { %v527_v15 = vrot.slane %v526_v13, 4 }
 0x195   : > { %v528_v17 = vadd.f32 %v527_v15, %v526_v13 }
 0x197   : > { %v529_v20 = vrot.slane %v528_v17, 2 }
 0x199   : > { %v530_v23 = vadd.f32 %v529_v20, %v528_v17 }
 0x19a   : > { %v619_v25 = vpop.xlane.xlu2 %618 }
 0x19b   : > { %v620_v27 = vrot.slane %v619_v25, 4  ;;  %v531_v28 = vrot.slane %v530_v23, 1 }
 0x19d   : > { %v621_v31 = vadd.f32 %v620_v27, %v619_v25  ;;  %v532_v32 = vadd.f32 %v531_v28, %v530_v23 }
 0x19f   : > { %v622_v35 = vrot.slane %v621_v31, 2  ;;  %900 = vpush %v532_v32 }
 0x1a0   : > { %902 = vpush %v579_v34 }
 0x1a1   : > { %v623_v38 = vadd.f32 %v622_v35, %v621_v31  ;;  %904 = vpush %v590_v36 }
 0x1a2   : > { %906 = vpush %v602_v37 }
 0x1a3   : > { %v624_v40 = vrot.slane %v623_v38, 1 }
 0x1a5   : > { %v625_v41 = vadd.f32 %v624_v40, %v623_v38 }
 0x1a7   : > { %908 = vpush %v625_v41 }
 0x1a8   : > { %910 = vpush %v649_v42 }
 0x1d0   : > { %s901_s21 = spop %900 }
 0x1d1   : > { %s903_s30 = spop %902 }
 0x1d2   : > { %s905_s14 = spop %904  ;;  %s581_s20 = sadd.f32 %s903_s30, %s901_s21 }
 0x1d3   : > { %s907_s2 = spop %906  ;;  %s1109_s21 = scalar_lea.hbm %s1108_s11, 8 }
 0x1d4   : > { %s604_s13 = sadd.f32 %s907_s2, %s905_s14  ;;  %v660_v47 = vstv %s581_s20  ;;  %p1110_p1 = scmp.ne.s32.totalorder %s1108_s11, %s1109_s21 }
 0x1d5   : > { %v661_v48 = vsel %vm1356_vm11, %v660_v47, 0.0  ;;  %s1113_s14 = scalar_lea.hbm %s1401_s4, 16 }
 0x1d6   : > { %v664_v49 = vstv %s604_s13  ;;  %p1111_p4 = pnand %p1110_p1, %p1266_p7  ;;  %p1115_p10 = scmp.lt.s32.totalorder %s1113_s14, %s1109_s21 }
 0x1d7   : > { %v665_v50 = vsel %vm663_vm14, %v664_v49, %v661_v48 }
 0x1d8   : > { %s909_s24 = spop %908  ;;  %p1112_p8 = pneg %p1111_p4 }
 0x1d9   : > { %s911_s5 = spop %910  ;;  %p1116_p2 = por %p1115_p10, %p1114_p9 }
 0x1da   : > { %s651_s0 = sadd.f32 %s911_s5, %s909_s24 }
 0x1db   : > { %p1117_p11 = pnand %p1116_p2, %p1112_p8 }
 0x1dc   : > { %s652_s6 = smul.f32 0.5, %s651_s0 }
 0x1de   : > { %v668_v51 = vstv %s652_s6 }
 0x1df   : > { %v669_v52 = vsel %vm667_vm15, %v668_v51, %v665_v50 }
 0x1e0   : > { %670 = vst [vmem:[%s275_s19] sm:$0xff] %v669_v52 }
 0x1e1   : > { %1120 = shalt.err (!%p1117_p11)
}
 0x1e2   : > { %920 = dma.vmem_to_hbm [thread:$0]  (%p1266_p7), %s685_s26, 128, %s687_s27, %s672_s10  }
 0x1e3 PF: > { %s698_s8 = sand.u32 1, %s1155_s15   ;;  %p1414_p12 = scmp.ge.s32.totalorder %s1167_s18, 2 }
 0x1e4   : > { %s699_s7 = scalar_lea.sflag [#allocation4], %s698_s8 }
 0x1e5   : > { %p934_p13 = pnand %p1414_p12, %p1234_p6 }
 0x1e7   : > { %p935_p0 = pneg %p934_p13 }
 0x1e9   : > { %1150 = dma.done.wait (%p935_p0), %s699_s7, 128  }
 0x1ea   : > { %1152 = vsyncadd (%p935_p0), %s699_s7, 4294967168  ;;  %s1415_s13 = sld [smem:[#allocation13_spill]]  ;;  %p20_p3 = scmp.ge.s32.totalorder %s1252_s29, 4  }
 0x1eb   : > { %s1416_s15 = smov %s1159_s16  ;;  %s1417_s16 = smov %s1163_s17 }
 0x1ec   : > { %s1419_s18 = smov %s1252_s29  ;;  %22 = sbr.rel (!%p20_p3) target bundleno = 10 (0xa), region = 98 }
 0x1f0   : > { %s1418_s17 = smov %s1415_s13 }
 0x1f1   :  { %705 = vsyncpa [#allocation3], 1 }
 0x1f2   :  { %707 = vsyncpa [#allocation3 + $0x1], 1 }
 0x1f3   :  { %708 = vsyncpa [#allocation6], 1 }
 0x1f4   :  { %710 = vsyncpa [#allocation6 + $0x1], 1 }
 0x1f5   :  { %711 = vsyncpa [#allocation4], 1 }
 0x1f6   :  { %713 = vsyncpa [#allocation4 + $0x1], 1 }

// kernel: tpu_custom_call.1
= control target key start
LH: loop header
LB: loop body
LE: loop exit
PB: predicated region body
PF: predicated region fallthrough
CT: control target
= control target key end

     0   :  { %s1397_s0 = inlined_call_operand.hbm [shape: bf16[32,128], index: 0, kind: input, shape index: {}]   ;;  %s1398_s1 = inlined_call_operand.hbm [shape: bf16[32,128], index: 1, kind: input, shape index: {}]   ;;  %s1399_s2 = inlined_call_operand.hbm [shape: bf16[128,256], index: 2, kind: input, shape index: {}]   ;;  %s1400_s3 = inlined_call_operand.vmem [shape: f32[1,128], index: 3, kind: input, shape index: {}]   ;;  %s1401_s4 = inlined_call_operand.hbm [shape: f32[16,128], index: 4, kind: output, shape index: {}]  }
   0x1   :  { %1402 = sst [smem:[#allocation14_spill]] %s1397_s0 }
   0x2   :  { %1403 = sst [smem:[#allocation15_spill]] %s1399_s2 }
   0x3   :  { %9 = vsyncpa [#allocation3], 0 }
   0x4   :  { %11 = vsyncpa [#allocation3 + $0x1], 0 }
   0x5   :  { %12 = vsyncpa [#allocation6], 0 }
   0x6   :  { %14 = vsyncpa [#allocation6 + $0x1], 0 }
   0x7   :  { %15 = vsyncpa [#allocation4], 0 }
   0x8   :  { %17 = vsyncpa [#allocation4 + $0x1], 0  ;;  %s1199_s15 = smov 0   ;;  %s1201_s16 = smov 0  }
   0x9   :  { %s1203_s17 = smov 0   ;;  %s1205_s18 = smov 0  }
   0xa LB: > { %s1220_s19 = sadd.s32 4294967295, %s1167_s18   ;;  %s789_s20 = sadd.s32 4294967294, %s1167_s18   ;;  %s1167_s18 = sphi %s1205_s18, %s1419_s18   ;;  %s1163_s17 = sphi %s1203_s17, %s1418_s17   ;;  %s1159_s16 = sphi %s1201_s16, %s1417_s16   ;;  %s1155_s15 = sphi %s1199_s15, %s1416_s15  }
   0xb   : > { %p43_p0 = scmp.ne.s32.totalorder %s1159_s16, %s1155_s15  ;;  %p44_p1 = scmp.eq.s32.totalorder %s1220_s19, 0 }
   0xc   : > { %p135_p2 = scmp.eq.s32.totalorder %s1220_s19, 1  ;;  %p141_p3 = scmp.eq.s32.totalorder %s789_s20, 1 }
   0xd   : > { %p1229_p4 = por %p44_p1, %p43_p0  ;;  %p790_p5 = scmp.ge.s32.totalorder %s1167_s18, 1 }
   0xe   : > { %p1234_p6 = por %p141_p3, %p43_p0  ;;  %p148_p7 = scmp.lt.s32.totalorder %s1167_s18, 3 }
   0xf   : > { %s1406_s2 = sld [smem:[#allocation15_spill]]  ;;  %s1169_s27 = smov [#allocation7]  }
  0x10   : > { %p1242_p8 = pnand %p790_p5, %p148_p7  ;;  %s161_s28 = sshll.u32 %s1169_s27, 4  ;;  %s162_s28 = int_to_ptr.vmem [resolvable:$true] %s161_s28 }
  0x11   : > { %s1252_s29 = sadd.s32 1, %s1167_s18   ;;  %s1170_s30 = smov 128  }
  0x12   : > { %p922_p9 = pneg %p1242_p8  ;;  %s1171_s5 = smov 8  }
  0x13   : > { %s27_s6 = ssub.s32 %s1167_s18, %s1252_s29  ;;  %s30_s7 = sadd.s32 1, %s1163_s17 }
  0x14   : > { %p923_p10 = pnand %p922_p9, %p44_p1  ;;  %p28_p12 = scmp.eq.s32.totalorder %s27_s6, 0 }
  0x15   : > { %s159_s25 = sshll.u32 %s1406_s2, 4  ;;  %p37_p13 = scmp.ne.s32.totalorder %s1163_s17, %s1159_s16  ;;  %s160_s25 = int_to_ptr.hbm [resolvable:$true] %s159_s25 }
  0x16   : > { %925 = dma.hbm_to_vmem [thread:$0]  (!%p923_p10), %s160_s25, 2048, %s162_s28, [#allocation6], %s1170_s30, %s1170_s30, %s1171_s5  }
  0x17   : > { %p38_p0 = scmp.eq.s32.totalorder %s1167_s18, 0  ;;  %p938_p3 = scmp.lt.s32.totalorder %s1167_s18, 2 }
  0x18   : > { %s1262_s8 = scalar_select %p28_p12, %s1163_s17, %s30_s7  }
  0x19   : > { %p39_p5 = por %p38_p0, %p37_p13  ;;  %p1266_p7 = por %p135_p2, %p37_p13 }
  0x1a   : > { %1408 = sst [smem:[#allocation13_spill]] %s1262_s8  ;;  %s178_s10 = sand.u32 1, %s1163_s17  }
  0x1b   : > { %s880_s11 = sshll.u32 %s1167_s18, 3  ;;  %s1272_s12 = sshll.u32 %s178_s10, 3 }
  0x1c   : > { %s1410_s0 = sld [smem:[#allocation14_spill]]  ;;  %s182_s24 = scalar_lea.vmem [#allocation2], %s1272_s12 }
  0x1d   : > { %s190_s25 = sshll.u32 %s182_s24, 4  ;;  %p1280_p9 = pnand %p938_p3, %p39_p5  ;;  %s191_s25 = int_to_ptr.vmem [resolvable:$true] %s190_s25 }
  0x1e   : > { %s209_s5 = scalar_lea.hbm %s1398_s1, %s880_s11  ;;  %s179_s6 = scalar_lea.sflag [#allocation3], %s178_s10 }
  0x1f   : > { %p1037_p10 = pneg %p1280_p9 }
  0x22   : > { %s187_s20 = scalar_lea.hbm %s1410_s0, %s880_s11  ;;  %s1040_s24 = scalar_lea.hbm %s1410_s0, 16 }
  0x23   : > { %s188_s23 = sshll.u32 %s187_s20, 4  ;;  %s189_s23 = int_to_ptr.hbm [resolvable:$true] %s188_s23 }
  0x24   : > { %s1033_s7 = sshra.s32 %s189_s23, 4  ;;  %s1034_s7 = int_to_ptr.hbm [resolvable:$true] %s1033_s7 }
  0x25   : > { %s1035_s13 = scalar_lea.hbm %s1034_s7, 8  ;;  %p1041_p0 = scmp.lt.s32.totalorder %s1034_s7, %s1410_s0 }
  0x26   : > { %p1036_p2 = scmp.ne.s32.totalorder %s1034_s7, %s1035_s13  ;;  %p1042_p3 = scmp.lt.s32.totalorder %s1040_s24, %s1035_s13 }
  0x28   : > { %p1038_p12 = pnand %p1037_p10, %p1036_p2  ;;  %p1043_p5 = por %p1042_p3, %p1041_p0 }
  0x2a   : > { %p1039_p13 = pneg %p1038_p12 }
  0x2c   : > { %p1044_p11 = pnand %p1043_p5, %p1039_p13 }
  0x2e   : > { %1047 = shalt.err (!%p1044_p11)
}
  0x2f   : > { %s1172_s10 = smov 64   ;;  %s1173_s11 = smov 4  }
  0x30   : > { %929 = dma.hbm_to_vmem [thread:$0]  (!%p1280_p9), %s189_s23, 128, %s191_s25, %s179_s6, %s1172_s10, %s1172_s10, %s1173_s11  }
  0x31   : > { %s210_s30 = sshll.u32 %s209_s5, 4  ;;  %s204_s8 = scalar_lea.vmem [#allocation5], %s1272_s12  ;;  %s211_s30 = int_to_ptr.hbm [resolvable:$true] %s210_s30 }
  0x32   : > { %s212_s14 = sshll.u32 %s204_s8, 4  ;;  %s200_s20 = sand.u32 1, %s1167_s18   ;;  %s213_s14 = int_to_ptr.vmem [resolvable:$true] %s212_s14 }
  0x33   : > { %s201_s2 = scalar_lea.sflag [#allocation6], %s200_s20  ;;  %s1063_s7 = sshra.s32 %s211_s30, 4  ;;  %s1064_s7 = int_to_ptr.hbm [resolvable:$true] %s1063_s7 }
  0x34   : > { %s1065_s13 = scalar_lea.hbm %s1064_s7, 8  ;;  %s1070_s0 = scalar_lea.hbm %s1398_s1, 16 }
  0x35   : > { %p1066_p2 = scmp.ne.s32.totalorder %s1064_s7, %s1065_s13  ;;  %p1071_p13 = scmp.lt.s32.totalorder %s1064_s7, %s1398_s1 }
  0x36   : > { %p1072_p0 = scmp.lt.s32.totalorder %s1070_s0, %s1065_s13 }
  0x37   : > { %p1068_p11 = pnand %p1066_p2, %p1037_p10 }
  0x38   : > { %p1073_p3 = por %p1072_p0, %p1071_p13 }
  0x39   : > { %p1069_p12 = pneg %p1068_p11 }
  0x3b   : > { %p1074_p5 = pnand %p1073_p3, %p1069_p12 }
  0x3d   : > { %1077 = shalt.err (!%p1074_p5)
}
  0x3e   : > { %932 = dma.hbm_to_vmem [thread:$0]  (!%p1280_p9), %s211_s30, 128, %s213_s14, %s201_s2, %s1172_s10, %s1172_s10, %s1173_s11  }
  0x3f   : > { %224 = sbr.rel (%p1242_p8) target bundleno = 483 (0x1e3), region = 36  ;;  %s1316_s8 = sand.u32 (!%p1242_p8), 1, %s1159_s16  }
  0x40   : > { %s1319_s12 = sshll.u32 (!%p1242_p8), %s1316_s8, 3  ;;  %s227_s5 = scalar_lea.sflag (!%p1242_p8), [#allocation3], %s1316_s8 }
  0x41   : > { %s230_s0 = scalar_lea.vmem (!%p1242_p8), [#allocation2], %s1319_s12 }
  0x44   : > { %1138 = dma.done.wait (%p1229_p4), %s227_s5, 128  }
  0x45   : > { %1140 = vsyncadd (%p1229_p4), %s227_s5, 4294967168  ;;  %s236_s26 = sand.u32 1, %s1220_s19   ;;  %s240_s6 = scalar_lea.vmem [#allocation5], %s1319_s12 }
  0x46   : > { %s237_s27 = scalar_lea.sflag [#allocation6], %s236_s26 }
  0x47   : > { %1142 = dma.done.wait (%p1229_p4), %s237_s27, 128  }
  0x48   : > { %1144 = vsyncadd (%p1229_p4), %s237_s27, 4294967168 }
  0x49   : > { %1146 = dma.done.wait (%p44_p1), [#allocation6], 2048  }
  0x4a   : > { %1148 = vsyncadd (%p44_p1), [#allocation6], 4294965248  ;;  %v866_v0 = vld [vmem:[#allocation7 + $0x70] sm:$0xf]  ;;  %v899_v1 = vld [vmem:[#allocation7 + $0x74] sm:$0xf0] }
  0x4b   : > { %v898_v2 = vld [vmem:[#allocation7 + $0x74] sm:$0xf]  ;;  %v867_v3 = vor.u32 %v899_v1, %v866_v0  ;;  %v868_v4 = vld [vmem:[#allocation7 + $0x78] sm:$0xf0]  ;;  %v978_v7 = vld [vmem:[%s1400_s3] ss:$0 sm:$0xff] }
  0x4c   : > { %v280_v5 = vld [vmem:[%s240_s6] sm:$0xff]   ;;  %v871_v6 = vor.u32 %v898_v2, %v868_v4  ;;  %v278_v9 = vld [vmem:[%s230_s0] sm:$0xff]   ;;  %vm568_vm0 = vcmask 7168   ;;  %s877_s7 = sshll.u32 %s1220_s19, 3  ;;  %s275_s19 = scalar_lea.vmem [#allocation8], %s1319_s12 }
  0x4d   : > { %v474_v8 = vunpack.c.l.bf16 %v280_v5  ;;  %v858_v10 = vld [vmem:[#allocation7 + $0x60] sm:$0xf]  ;;  %384 = vmatpush.bf16.msra.mxu0 %v867_v3  ;;  %418 = vmatpush.bf16.msra.mxu2 %v867_v3  ;;  %v463_v11 = vunpack.c.l.bf16 %v278_v9  ;;  %v897_v12 = vld [vmem:[#allocation7 + $0x64] sm:$0xf0]  ;;  %v896_v13 = vld [vmem:[#allocation7 + $0x64] sm:$0xf]  ;;  %v475_v23 = vunpack.c.h.bf16 %v280_v5  ;;  %v464_v25 = vunpack.c.h.bf16 %v278_v9  ;;  %s682_s25 = scalar_lea.hbm %s1401_s4, %s877_s7 }
  0x4e   : > { %v860_v14 = vld [vmem:[#allocation7 + $0x68] sm:$0xf0]  ;;  %398 = vmatpush.bf16.msra.mxu1 %v871_v6  ;;  %432 = vmatpush.bf16.msra.mxu3 %v871_v6  ;;  %v859_v16 = vor.u32 %v897_v12, %v858_v10  ;;  %v850_v18 = vld [vmem:[#allocation7 + $0x50] sm:$0xf]  ;;  %v895_v19 = vld [vmem:[#allocation7 + $0x54] sm:$0xf0] }
  0x4f   : > { %v476_v15 = vmul.f32 %v978_v7, %v474_v8  ;;  %v863_v17 = vor.u32 %v896_v13, %v860_v14  ;;  %v468_v20 = vmul.f32 %v978_v7, %v463_v11  ;;  %v894_v21 = vld [vmem:[#allocation7 + $0x54] sm:$0xf]  ;;  %v852_v22 = vld [vmem:[#allocation7 + $0x58] sm:$0xf0]  ;;  %v851_v24 = vor.u32 %v895_v19, %v850_v18  ;;  %v842_v27 = vld [vmem:[#allocation7 + $0x40] sm:$0xf] }
  0x50   : > { %v855_v26 = vor.u32 %v894_v21, %v852_v22  ;;  %v893_v28 = vld [vmem:[#allocation7 + $0x44] sm:$0xf0]  ;;  %v892_v29 = vld [vmem:[#allocation7 + $0x44] sm:$0xf]  ;;  %v844_v30 = vld [vmem:[#allocation7 + $0x48] sm:$0xf0]  ;;  %v477_v31 = vmul.f32 %v978_v7, %v475_v23  ;;  %v469_v32 = vmul.f32 %v978_v7, %v464_v25 }
  0x51   : > { %478 = vadd.xlane.f32.xlu1 %v476_v15  ;;  %470 = vadd.xlane.f32.xlu0 %v468_v20  ;;  %v843_v33 = vor.u32 %v893_v28, %v842_v27  ;;  %v847_v34 = vor.u32 %v892_v29, %v844_v30  ;;  %v834_v35 = vld [vmem:[#allocation7 + $0x30] sm:$0xf]  ;;  %v891_v36 = vld [vmem:[#allocation7 + $0x34] sm:$0xf0]  ;;  %v890_v37 = vld [vmem:[#allocation7 + $0x34] sm:$0xf] }
  0x52   : > { %385 = vmatpush.bf16.msra.mxu0 %v859_v16  ;;  %399 = vmatpush.bf16.msra.mxu1 %v863_v17  ;;  %v836_v38 = vld [vmem:[#allocation7 + $0x38] sm:$0xf0]  ;;  %v835_v39 = vor.u32 %v891_v36, %v834_v35  ;;  %v826_v41 = vld [vmem:[#allocation7 + $0x20] sm:$0xf]  ;;  %v889_v42 = vld [vmem:[#allocation7 + $0x24] sm:$0xf0] }
  0x53   : > { %419 = vmatpush.bf16.msra.mxu2 %v859_v16  ;;  %433 = vmatpush.bf16.msra.mxu3 %v863_v17  ;;  %v839_v40 = vor.u32 %v890_v37, %v836_v38  ;;  %v888_v43 = vld [vmem:[#allocation7 + $0x24] sm:$0xf]  ;;  %v828_v44 = vld [vmem:[#allocation7 + $0x28] sm:$0xf0]  ;;  %v827_v45 = vor.u32 %v889_v42, %v826_v41  ;;  %v818_v47 = vld [vmem:[#allocation7 + $0x10] sm:$0xf] }
  0x54   : > { %v831_v46 = vor.u32 %v888_v43, %v828_v44  ;;  %v887_v48 = vld [vmem:[#allocation7 + $0x14] sm:$0xf0]  ;;  %v886_v49 = vld [vmem:[#allocation7 + $0x14] sm:$0xf]  ;;  %v820_v50 = vld [vmem:[#allocation7 + $0x18] sm:$0xf0] }
  0x55   : > { %v819_v51 = vor.u32 %v887_v48, %v818_v47  ;;  %v823_v52 = vor.u32 %v886_v49, %v820_v50  ;;  %v810_v53 = vld [vmem:[#allocation7] sm:$0xf]  ;;  %v885_v54 = vld [vmem:[#allocation7 + $0x4] sm:$0xf0]  ;;  %v884_v55 = vld [vmem:[#allocation7 + $0x4] sm:$0xf] }
  0x56   : > { %386 = vmatpush.bf16.msra.mxu0 %v851_v24  ;;  %400 = vmatpush.bf16.msra.mxu1 %v855_v26  ;;  %v812_v56 = vld [vmem:[#allocation7 + $0x8] sm:$0xf0]  ;;  %v811_v57 = vor.u32 %v885_v54, %v810_v53  ;;  %v883_v60 = vld [vmem:[%s240_s6] sm:$0xff]  ;;  %s684_s26 = sshll.u32 %s275_s19, 4  ;;  %s686_s27 = sshll.u32 %s682_s25, 4  ;;  %s685_s26 = int_to_ptr.vmem [resolvable:$true] %s684_s26  ;;  %s687_s27 = int_to_ptr.hbm [resolvable:$true] %s686_s27 }
  0x57   : > { %420 = vmatpush.bf16.msra.mxu2 %v851_v24  ;;  %434 = vmatpush.bf16.msra.mxu3 %v855_v26  ;;  %v815_v58 = vor.u32 %v884_v55, %v812_v56  ;;  %v882_v59 = vld [vmem:[%s230_s0] sm:$0xff]  ;;  %s672_s10 = scalar_lea.sflag [#allocation4], %s1316_s8  ;;  %s1107_s11 = sshra.s32 %s687_s27, 4  ;;  %s1108_s11 = int_to_ptr.hbm [resolvable:$true] %s1107_s11 }
  0x58   : > { %p1114_p9 = scmp.lt.s32.totalorder %s1108_s11, %s1401_s4 }
  0x59   : > { %480 = vadd.xlane.f32.xlu1 %v477_v31  ;;  %472 = vadd.xlane.f32.xlu0 %v469_v32 }
  0x5a   : > { %387 = vmatpush.bf16.msra.mxu0 %v843_v33  ;;  %401 = vmatpush.bf16.msra.mxu1 %v847_v34 }
  0x5b   : > { %421 = vmatpush.bf16.msra.mxu2 %v843_v33  ;;  %435 = vmatpush.bf16.msra.mxu3 %v847_v34 }
  0x5e   : > { %388 = vmatpush.bf16.msra.mxu0 %v835_v39  ;;  %402 = vmatpush.bf16.msra.mxu1 %v839_v40 }
  0x5f   : > { %422 = vmatpush.bf16.msra.mxu2 %v835_v39  ;;  %436 = vmatpush.bf16.msra.mxu3 %v839_v40 }
  0x62   : > { %389 = vmatpush.bf16.msra.mxu0 %v827_v45  ;;  %403 = vmatpush.bf16.msra.mxu1 %v831_v46 }
  0x63   : > { %423 = vmatpush.bf16.msra.mxu2 %v827_v45  ;;  %437 = vmatpush.bf16.msra.mxu3 %v831_v46 }
  0x66   : > { %390 = vmatpush.bf16.msra.mxu0 %v819_v51  ;;  %404 = vmatpush.bf16.msra.mxu1 %v823_v52 }
  0x67   : > { %424 = vmatpush.bf16.msra.mxu2 %v819_v51  ;;  %438 = vmatpush.bf16.msra.mxu3 %v823_v52 }
  0x6a   : > { %391 = vmatpush.bf16.msra.mxu0 %v811_v57  ;;  %405 = vmatpush.bf16.msra.mxu1 %v815_v58 }
  0x6b   : > { %425 = vmatpush.bf16.msra.mxu2 %v811_v57  ;;  %439 = vmatpush.bf16.msra.mxu3 %v815_v58 }
  0x6d   : > { %392 = vmatmul.bf16.vlgmr.msra.gmra.mxu0 %v882_v59  ;;  %406 = vmatmul.bf16.vlgmr.msra.gmra.mxu1 %v882_v59 }
  0x6e   : > { %426 = vmatmul.bf16.vlgmr.msra.gmra.mxu2 %v883_v60  ;;  %440 = vmatmul.bf16.vlgmr.msra.gmra.mxu3 %v883_v60 }
  0xc4   : > { %v479_v61 = vpop.xlane.xlu1 %478  ;;  %v471_v63 = vpop.xlane.xlu0 %470 }
  0xc5   : > { %v486_v62 = vmul.f32 %v479_v61, %v479_v61  ;;  %v482_v0 = vmul.f32 %v471_v63, %v471_v63 }
  0xc7   : > { %v488_v1 = vmax.f32 %v486_v62, 1e-07  ;;  %v484_v2 = vmax.f32 %v482_v0, 1e-07 }
  0xc9   : > { %v536_v3 = vmul.f32 %v488_v1, %v484_v2  ;;  %v592_v9 = vsel %vm568_vm0, %v488_v1, 0.0  ;;  %v534_v28 = vadd.f32 %v488_v1, %v484_v2 }
  0xcb   : > { %979 = vrsqrt.f32 %v536_v3  ;;  %vm545_vm1 = vcmp.eq.f32.partialorder %v536_v3, inf  ;;  %v548_v22 = vand.u32 2147483648, %v536_v3  ;;  %vm547_vm2 = vcmp.eq.f32.partialorder %v536_v3, 0.0 }
  0xcc   : > { %v481_v4 = vpop.xlane.xlu1 %480  ;;  %v473_v6 = vpop.xlane.xlu0 %472 }
  0xcd   : > { %v487_v5 = vmul.f32 %v481_v4, %v481_v4  ;;  %v483_v7 = vmul.f32 %v473_v6, %v473_v6 }
  0xcf   : > { %v489_v8 = vmax.f32 %v487_v5, 1e-07  ;;  %v485_v10 = vmax.f32 %v483_v7, 1e-07 }
  0xd1   : > { %v593_v11 = vsel %vm568_vm0, %v489_v8, 0.0  ;;  %v980_v12 = vpop.eup %979  ;;  %v537_v13 = vmul.f32 %v489_v8, %v485_v10  ;;  %v535_v35 = vadd.f32 %v489_v8, %v485_v10 }
  0xd2   : > { %v594_v14 = vadd.f32 %v593_v11, %v592_v9  ;;  %v539_v15 = vmul.f32 %v980_v12, %v536_v3 }
  0xd3   : > { %981 = vrsqrt.f32 %v537_v13  ;;  %vm557_vm3 = vcmp.eq.f32.partialorder %v537_v13, inf  ;;  %v560_v32 = vand.u32 2147483648, %v537_v13  ;;  %vm559_vm4 = vcmp.eq.f32.partialorder %v537_v13, 0.0 }
  0xd4   : > { %595 = vadd.xlane.f32.xlu1 %v594_v14  ;;  %v540_v16 = vmul.f32 %v980_v12, %v539_v15  ;;  %983 = vlog2.f32 %v484_v2 }
  0xd5   : > { %985 = vlog2.f32 %v488_v1 }
  0xd6   : > { %v541_v17 = vmul.f32 0.5, %v540_v16  ;;  %987 = vlog2.f32 %v489_v8 }
  0xd7   : > { %989 = vlog2.f32 %v485_v10 }
  0xd8   : > { %v542_v18 = vsub.f32 1.5, %v541_v17 }
  0xd9   : > { %v982_v19 = vpop.eup %981 }
  0xda   : > { %v543_v20 = vmul.f32 %v980_v12, %v542_v18  ;;  %v551_v21 = vmul.f32 %v982_v19, %v537_v13  ;;  %v984_v54 = vpop.eup %983 }
  0xdb   : > { %v986_v57 = vpop.eup %985  ;;  %v632_v7 = vmul.f32 0.6931472, %v984_v54 }
  0xdc   : > { %v544_v23 = vmul.f32 %v543_v20, %v536_v3  ;;  %v552_v24 = vmul.f32 %v982_v19, %v551_v21  ;;  %v988_v60 = vpop.eup %987 }
  0xdd   : > { %v990_v61 = vpop.eup %989  ;;  %v630_v6 = vmul.f32 0.6931472, %v988_v60 }
  0xde   : > { %v546_v25 = vsel %vm545_vm1, %v536_v3, %v544_v23  ;;  %v553_v26 = vmul.f32 0.5, %v552_v24  ;;  %v628_v3 = vmul.f32 0.6931472, %v986_v57  ;;  %v634_v8 = vmul.f32 0.6931472, %v990_v61 }
  0xdf   : > { %v549_v27 = vsel %vm547_vm2, %v548_v22, %v546_v25 }
  0xe0   : > { %v554_v29 = vsub.f32 1.5, %v553_v26  ;;  %v562_v30 = vmul.f32 2.0, %v549_v27  ;;  %v635_v12 = vsub.f32 %v628_v3, %v632_v7 }
  0xe2   : > { %v555_v31 = vmul.f32 %v982_v19, %v554_v29  ;;  %v564_v34 = vsub.f32 %v534_v28, %v562_v30  ;;  %v637_v19 = vand.u32 2147483647, %v635_v12 }
  0xe4   : > { %v556_v33 = vmul.f32 %v555_v31, %v537_v13  ;;  %v566_v39 = vmax.f32 %v564_v34, 0.0  ;;  %v639_v23 = vsel %vm568_vm0, %v637_v19, 0.0 }
  0xe6   : > { %v558_v36 = vsel %vm557_vm3, %v537_v13, %v556_v33  ;;  %v569_v46 = vsel %vm568_vm0, %v566_v39, 0.0  ;;  %v636_v13 = vsub.f32 %v630_v6, %v634_v8 }
  0xe7   : > { %v561_v37 = vsel %vm559_vm4, %v560_v32, %v558_v36 }
  0xe8   : > { %v563_v38 = vmul.f32 2.0, %v561_v37  ;;  %v638_v20 = vand.u32 2147483647, %v636_v13 }
  0xea   : > { %v393_v40 = vpop.f32.mrf.mxu0  ;;  %v407_v41 = vpop.f32.mrf.mxu1  ;;  %v565_v42 = vsub.f32 %v535_v35, %v563_v38  ;;  %v640_v24 = vsel %vm568_vm0, %v638_v20, 0.0 }
  0xeb   : > { %v446_v43 = vmul.f32 %v393_v40, %v393_v40  ;;  %v448_v44 = vmul.f32 %v407_v41, %v407_v41  ;;  %v641_v28 = vadd.f32 %v640_v24, %v639_v23 }
  0xec   : > { %v567_v45 = vmax.f32 %v565_v42, 0.0 }
  0xed   : > { %v450_v49 = vadd.f32 %v448_v44, %v446_v43 }
  0xee   : > { %v570_v47 = vsel %vm568_vm0, %v567_v45, 0.0 }
  0xef   : > { %v571_v48 = vadd.f32 %v570_v47, %v569_v46  ;;  %v452_v58 = vmax.f32 %v450_v49, 1e-07 }
  0xf1   : > { %v427_v50 = vpop.f32.mrf.mxu2  ;;  %v441_v52 = vpop.f32.mrf.mxu3  ;;  %572 = vadd.xlane.f32.xlu2 %v571_v48 }
  0xf2   : > { %v454_v51 = vmul.f32 %v427_v50, %v427_v50  ;;  %v456_v53 = vmul.f32 %v441_v52, %v441_v52  ;;  %v395_v55 = vpop.f32.mrf.mxu0  ;;  %v409_v56 = vpop.f32.mrf.mxu1 }
  0xf3   : > { %v447_v63 = vmul.f32 %v395_v55, %v395_v55  ;;  %v449_v0 = vmul.f32 %v409_v56, %v409_v56 }
  0xf4   : > { %v458_v59 = vadd.f32 %v456_v53, %v454_v51 }
  0xf5   : > { %v451_v9 = vadd.f32 %v449_v0, %v447_v63 }
  0xf6   : > { %v460_v62 = vmax.f32 %v458_v59, 1e-07 }
  0xf7   : > { %v453_v14 = vmax.f32 %v451_v9, 1e-07 }
  0xf8   : > { %v492_v1 = vmul.f32 %v460_v62, %v452_v58  ;;  %v490_v43 = vadd.f32 %v460_v62, %v452_v58 }
  0xf9   : > { %v429_v2 = vpop.f32.mrf.mxu2  ;;  %v443_v5 = vpop.f32.mrf.mxu3 }
  0xfa   : > { %v455_v4 = vmul.f32 %v429_v2, %v429_v2  ;;  %v457_v10 = vmul.f32 %v443_v5, %v443_v5  ;;  %991 = vrsqrt.f32 %v492_v1  ;;  %vm501_vm5 = vcmp.eq.f32.partialorder %v492_v1, inf }
  0xfb   : > { %v504_v35 = vand.u32 2147483648, %v492_v1  ;;  %vm503_vm6 = vcmp.eq.f32.partialorder %v492_v1, 0.0 }
  0xfc   : > { %v459_v11 = vadd.f32 %v457_v10, %v455_v4 }
  0xfe   : > { %v461_v15 = vmax.f32 %v459_v11, 1e-07 }
 0x100   : > { %v992_v16 = vpop.eup %991  ;;  %v493_v17 = vmul.f32 %v461_v15, %v453_v14  ;;  %v582_v18 = vadd.f32 %v461_v15, %v460_v62  ;;  %v491_v48 = vadd.f32 %v461_v15, %v453_v14 }
 0x101   : > { %v495_v21 = vmul.f32 %v992_v16, %v492_v1 }
 0x102   : > { %583 = vadd.xlane.f32.xlu0 %v582_v18  ;;  %993 = vrsqrt.f32 %v493_v17  ;;  %vm513_vm7 = vcmp.eq.f32.partialorder %v493_v17, inf  ;;  %v516_v41 = vand.u32 2147483648, %v493_v17  ;;  %vm515_vm8 = vcmp.eq.f32.partialorder %v493_v17, 0.0 }
 0x103   : > { %v496_v22 = vmul.f32 %v992_v16, %v495_v21  ;;  %995 = vlog2.f32 %v452_v58 }
 0x104   : > { %997 = vlog2.f32 %v461_v15 }
 0x105   : > { %v497_v25 = vmul.f32 0.5, %v496_v22  ;;  %999 = vlog2.f32 %v460_v62 }
 0x106   : > { %1001 = vlog2.f32 %v453_v14 }
 0x107   : > { %v498_v26 = vsub.f32 1.5, %v497_v25 }
 0x108   : > { %v994_v27 = vpop.eup %993 }
 0x109   : > { %v499_v29 = vmul.f32 %v992_v16, %v498_v26  ;;  %v507_v30 = vmul.f32 %v994_v27, %v493_v17  ;;  %v996_v42 = vpop.eup %995 }
 0x10a   : > { %642 = vadd.xlane.f32.xlu0 %v641_v28  ;;  %v998_v45 = vpop.eup %997  ;;  %v610_v54 = vmul.f32 0.6931472, %v996_v42 }
 0x10b   : > { %v500_v31 = vmul.f32 %v499_v29, %v492_v1  ;;  %v508_v32 = vmul.f32 %v994_v27, %v507_v30  ;;  %v1000_v47 = vpop.eup %999  ;;  %v608_v53 = vmul.f32 0.6931472, %v998_v45 }
 0x10c   : > { %v1002_v51 = vpop.eup %1001  ;;  %v606_v57 = vmul.f32 0.6931472, %v1000_v47 }
 0x10d   : > { %v502_v33 = vsel %vm501_vm5, %v492_v1, %v500_v31  ;;  %v509_v34 = vmul.f32 0.5, %v508_v32  ;;  %v612_v59 = vmul.f32 0.6931472, %v1002_v51 }
 0x10e   : > { %v505_v37 = vsel %vm503_vm6, %v504_v35, %v502_v33  ;;  %v613_v58 = vsub.f32 %v606_v57, %v610_v54 }
 0x10f   : > { %v510_v36 = vsub.f32 1.5, %v509_v34  ;;  %v518_v40 = vmul.f32 2.0, %v505_v37  ;;  %v614_v61 = vsub.f32 %v608_v53, %v612_v59 }
 0x110   : > { %v615_v63 = vand.u32 2147483647, %v613_v58 }
 0x111   : > { %v511_v38 = vmul.f32 %v994_v27, %v510_v36  ;;  %v520_v50 = vsub.f32 %v490_v43, %v518_v40  ;;  %v616_v62 = vand.u32 2147483647, %v614_v61  ;;  %v653_v43 = vlaneseq }
 0x113   : > { %v512_v39 = vmul.f32 %v511_v38, %v493_v17  ;;  %v522_v55 = vmax.f32 %v520_v50, 0.0  ;;  %v617_v0 = vadd.f32 %v616_v62, %v615_v63  ;;  %v656_v45 = vand.u32 127, %v653_v43 }
 0x115   : > { %v514_v44 = vsel %vm513_vm7, %v493_v17, %v512_v39  ;;  %vm658_vm10 = vcmp.eq.s32.totalorder %v656_v45, 0  ;;  %vm662_vm12 = vcmp.eq.s32.totalorder %v656_v45, 1  ;;  %vm666_vm13 = vcmp.eq.s32.totalorder %v656_v45, 2 }
 0x116   : > { %v517_v46 = vsel %vm515_vm8, %v516_v41, %v514_v44  ;;  %v654_v44 = vshrl.u32 %v653_v43, 7 }
 0x117   : > { %v519_v49 = vmul.f32 2.0, %v517_v46 }
 0x118   : > { %vm657_vm9 = vcmp.eq.s32.totalorder %v654_v44, 0 }
 0x119   : > { %v521_v52 = vsub.f32 %v491_v48, %v519_v49  ;;  %vm1356_vm11 = vmand %vm657_vm9, %vm658_vm10 }
 0x11a   : > { %vm663_vm14 = vmand %vm657_vm9, %vm662_vm12 }
 0x11b   : > { %v523_v56 = vmax.f32 %v521_v52, 0.0  ;;  %vm667_vm15 = vmand %vm657_vm9, %vm666_vm13 }
 0x11d   : > { %v524_v60 = vadd.f32 %v523_v56, %v522_v55 }
 0x11f   : > { %525 = vadd.xlane.f32.xlu2 %v524_v60 }
 0x127   : > { %618 = vadd.xlane.f32.xlu2 %v617_v0 }
 0x147   : > { %v596_v3 = vpop.xlane.xlu1 %595 }
 0x148   : > { %v597_v6 = vrot.slane %v596_v3, 4 }
 0x14a   : > { %v598_v10 = vadd.f32 %v597_v6, %v596_v3 }
 0x14c   : > { %v599_v16 = vrot.slane %v598_v10, 2 }
 0x14e   : > { %v600_v22 = vadd.f32 %v599_v16, %v598_v10 }
 0x150   : > { %v601_v30 = vrot.slane %v600_v22, 1 }
 0x152   : > { %v602_v37 = vadd.f32 %v601_v30, %v600_v22 }
 0x164   : > { %v573_v2 = vpop.xlane.xlu2 %572 }
 0x165   : > { %v574_v4 = vrot.slane %v573_v2, 4 }
 0x167   : > { %v575_v7 = vadd.f32 %v574_v4, %v573_v2 }
 0x169   : > { %v576_v11 = vrot.slane %v575_v7, 2 }
 0x16b   : > { %v577_v19 = vadd.f32 %v576_v11, %v575_v7 }
 0x16d   : > { %v578_v26 = vrot.slane %v577_v19, 1 }
 0x16f   : > { %v579_v34 = vadd.f32 %v578_v26, %v577_v19 }
 0x175   : > { %v584_v1 = vpop.xlane.xlu0 %583 }
 0x176   : > { %v585_v5 = vrot.slane %v584_v1, 4 }
 0x178   : > { %v586_v8 = vadd.f32 %v585_v5, %v584_v1 }
 0x17a   : > { %v587_v14 = vrot.slane %v586_v8, 2 }
 0x17c   : > { %v588_v21 = vadd.f32 %v587_v14, %v586_v8 }
 0x17d   : > { %v643_v9 = vpop.xlane.xlu0 %642 }
 0x17e   : > { %v644_v12 = vrot.slane %v643_v9, 4  ;;  %v589_v29 = vrot.slane %v588_v21, 1 }
 0x180   : > { %v645_v18 = vadd.f32 %v644_v12, %v643_v9  ;;  %v590_v36 = vadd.f32 %v589_v29, %v588_v21 }
 0x182   : > { %v646_v24 = vrot.slane %v645_v18, 2 }
 0x184   : > { %v647_v33 = vadd.f32 %v646_v24, %v645_v18 }
 0x186   : > { %v648_v39 = vrot.slane %v647_v33, 1 }
 0x188   : > { %v649_v42 = vadd.f32 %v648_v39, %v647_v33 }
 0x192   : > { %v526_v13 = vpop.xlane.xlu2 %525 }
 0x193   : > { %v527_v15 = vrot.slane %v526_v13, 4 }
 0x195   : > { %v528_v17 = vadd.f32 %v527_v15, %v526_v13 }
 0x197   : > { %v529_v20 = vrot.slane %v528_v17, 2 }
 0x199   : > { %v530_v23 = vadd.f32 %v529_v20, %v528_v17 }
 0x19a   : > { %v619_v25 = vpop.xlane.xlu2 %618 }
 0x19b   : > { %v620_v27 = vrot.slane %v619_v25, 4  ;;  %v531_v28 = vrot.slane %v530_v23, 1 }
 0x19d   : > { %v621_v31 = vadd.f32 %v620_v27, %v619_v25  ;;  %v532_v32 = vadd.f32 %v531_v28, %v530_v23 }
 0x19f   : > { %v622_v35 = vrot.slane %v621_v31, 2  ;;  %900 = vpush %v532_v32 }
 0x1a0   : > { %902 = vpush %v579_v34 }
 0x1a1   : > { %v623_v38 = vadd.f32 %v622_v35, %v621_v31  ;;  %904 = vpush %v590_v36 }
 0x1a2   : > { %906 = vpush %v602_v37 }
 0x1a3   : > { %v624_v40 = vrot.slane %v623_v38, 1 }
 0x1a5   : > { %v625_v41 = vadd.f32 %v624_v40, %v623_v38 }
 0x1a7   : > { %908 = vpush %v625_v41 }
 0x1a8   : > { %910 = vpush %v649_v42 }
 0x1d0   : > { %s901_s21 = spop %900 }
 0x1d1   : > { %s903_s30 = spop %902 }
 0x1d2   : > { %s905_s14 = spop %904  ;;  %s581_s20 = sadd.f32 %s903_s30, %s901_s21 }
 0x1d3   : > { %s907_s2 = spop %906  ;;  %s1109_s21 = scalar_lea.hbm %s1108_s11, 8 }
 0x1d4   : > { %s604_s13 = sadd.f32 %s907_s2, %s905_s14  ;;  %v660_v47 = vstv %s581_s20  ;;  %p1110_p1 = scmp.ne.s32.totalorder %s1108_s11, %s1109_s21 }
 0x1d5   : > { %v661_v48 = vsel %vm1356_vm11, %v660_v47, 0.0  ;;  %s1113_s14 = scalar_lea.hbm %s1401_s4, 16 }
 0x1d6   : > { %v664_v49 = vstv %s604_s13  ;;  %p1111_p4 = pnand %p1110_p1, %p1266_p7  ;;  %p1115_p10 = scmp.lt.s32.totalorder %s1113_s14, %s1109_s21 }
 0x1d7   : > { %v665_v50 = vsel %vm663_vm14, %v664_v49, %v661_v48 }
 0x1d8   : > { %s909_s24 = spop %908  ;;  %p1112_p8 = pneg %p1111_p4 }
 0x1d9   : > { %s911_s5 = spop %910  ;;  %p1116_p2 = por %p1115_p10, %p1114_p9 }
 0x1da   : > { %s651_s0 = sadd.f32 %s911_s5, %s909_s24 }
 0x1db   : > { %p1117_p11 = pnand %p1116_p2, %p1112_p8 }
 0x1dc   : > { %s652_s6 = smul.f32 0.5, %s651_s0 }
 0x1de   : > { %v668_v51 = vstv %s652_s6 }
 0x1df   : > { %v669_v52 = vsel %vm667_vm15, %v668_v51, %v665_v50 }
 0x1e0   : > { %670 = vst [vmem:[%s275_s19] sm:$0xff] %v669_v52 }
 0x1e1   : > { %1120 = shalt.err (!%p1117_p11)
}
 0x1e2   : > { %920 = dma.vmem_to_hbm [thread:$0]  (%p1266_p7), %s685_s26, 128, %s687_s27, %s672_s10  }
 0x1e3 PF: > { %s698_s8 = sand.u32 1, %s1155_s15   ;;  %p1414_p12 = scmp.ge.s32.totalorder %s1167_s18, 2 }
 0x1e4   : > { %s699_s7 = scalar_lea.sflag [#allocation4], %s698_s8 }
 0x1e5   : > { %p934_p13 = pnand %p1414_p12, %p1234_p6 }
 0x1e7   : > { %p935_p0 = pneg %p934_p13 }
 0x1e9   : > { %1150 = dma.done.wait (%p935_p0), %s699_s7, 128  }
 0x1ea   : > { %1152 = vsyncadd (%p935_p0), %s699_s7, 4294967168  ;;  %s1415_s13 = sld [smem:[#allocation13_spill]]  ;;  %p20_p3 = scmp.ge.s32.totalorder %s1252_s29, 4  }
 0x1eb   : > { %s1416_s15 = smov %s1159_s16  ;;  %s1417_s16 = smov %s1163_s17 }
 0x1ec   : > { %s1419_s18 = smov %s1252_s29  ;;  %22 = sbr.rel (!%p20_p3) target bundleno = 10 (0xa), region = 98 }
 0x1f0   : > { %s1418_s17 = smov %s1415_s13 }
 0x1f1   :  { %705 = vsyncpa [#allocation3], 1 }
 0x1f2   :  { %707 = vsyncpa [#allocation3 + $0x1], 1 }
 0x1f3   :  { %708 = vsyncpa [#allocation6], 1 }
 0x1f4   :  { %710 = vsyncpa [#allocation6 + $0x1], 1 }
 0x1f5   :  { %711 = vsyncpa [#allocation4], 1 }
 0x1f6   :  { %713 = vsyncpa [#allocation4 + $0x1], 1 }

</bundles_post_ra>
